<compile_context>
chip_gen: v7x
topology: tpu7x:2x2x1
jax: 0.10.0
libtpu: 0.0.40
codegen_flags: <defaults>
</compile_context>

<pallas_src>
import jax
import jax.numpy as jnp
import numpy as np
from jax.experimental import pallas as pl
from jax.experimental.pallas import tpu as pltpu

# ---- small synthetic configuration (consistent with the module) -------------
N, C, H, W = 2, 32, 16, 16      # x: [N, C, H, W]
EMB = 32                        # emb: [N, EMB]
C_OUT = C                       # out_channels=None -> out_channels == channels
GROUPS = 32                     # normalization() == GroupNorm32(32, channels)
EPS = 1e-5                      # torch.nn.GroupNorm default eps
PAD = 128                       # lane-aligned halo width for the conv row buffer


def _silu(v):
    return v * jax.nn.sigmoid(v)


# --------------------------------- kernel ------------------------------------
def _make_resblock_kernel(height, width, c_in, c_out, groups):
    hw = height * width
    cmax = max(c_in, c_out)

    def group_norm(hmat, g_ref, b_ref):
        """GroupNorm for one sample. hmat: [C, HW]; g/b refs: [C, 1]."""
        c = hmat.shape[0]
        if groups == c:
            # gsize == 1: per-channel statistics, no group matmuls at all.
            mean = jnp.mean(hmat, axis=1, keepdims=True)             # [C, 1]
            cen = hmat - mean
            var = jnp.mean(cen * cen, axis=1, keepdims=True)         # [C, 1]
        else:
            # General case: group-averaging matrix folded at trace time.
            gsize = c // groups
            gavg = jnp.asarray(
                np.kron(np.eye(groups, dtype=np.float32),
                        np.full((gsize, gsize), 1.0 / gsize, np.float32)))
            row_mean = jnp.mean(hmat, axis=1, keepdims=True)
            mean = jnp.dot(gavg, row_mean, preferred_element_type=jnp.float32)
            cen = hmat - mean
            row_var = jnp.mean(cen * cen, axis=1, keepdims=True)
            var = jnp.dot(gavg, row_var, preferred_element_type=jnp.float32)
        inv = jax.lax.rsqrt(var + EPS)
        return cen * inv * g_ref[...] + b_ref[...]

    def conv3x3(hmat, w_ref, cb_ref, pad_ref, im_ref, mask_xm1, mask_xp1):
        """3x3 'same' conv via im2col + one matmul.
        hmat: [Cin, HW]; w_ref: [Cout, 9*Cin]; returns [Cout, HW] f32."""
        # Interior store is lane-aligned (PAD multiple of 128); halo columns
        # stay zero (they are never written after the per-sample init).
        pad_ref[:, PAD:PAD + hw] = hmat
        k = 0
        for dy in (-1, 0, 1):
            for dx in (-1, 0, 1):
                s = dy * width + dx
                tap = pad_ref[:, PAD + s:PAD + s + hw]      # lane-shifted window
                if dx == -1:                                 # x-1 invalid at x == 0
                    tap = jnp.where(mask_xm1, tap, 0.0)
                elif dx == 1:                                # x+1 invalid at x == W-1
                    tap = jnp.where(mask_xp1, tap, 0.0)
                # sublane-aligned, full-lane (unmasked) store into the im2col slab
                im_ref[k * cmax:(k + 1) * cmax, :] = tap
                k += 1
        y = jnp.dot(w_ref[...], im_ref[...],                 # [Cout,9Cin]@[9Cin,HW]
                    preferred_element_type=jnp.float32)
        return y + cb_ref[...]

    def kernel(x_ref, emb_ref,
               g1_ref, be1_ref, w1_ref, cb1_ref,
               g2_ref, be2_ref, w2_ref, cb2_ref,
               out_ref, pad_ref, im_ref):
        x = x_ref[0]                                         # [C, HW]

        # Zero only the halo columns; the interior is fully overwritten by each
        # conv.  Done per grid step so every core's scratch is valid under
        # megacore ("parallel") scheduling.
        zeros_halo = jnp.zeros((cmax, PAD), jnp.float32)
        pad_ref[:, 0:PAD] = zeros_halo
        pad_ref[:, PAD + hw:2 * PAD + hw] = zeros_halo

        # Column-validity masks for the dx = +/-1 taps (row wrap in the
        # flattened layout); dy boundaries always land in the zero halo.
        xpos = jax.lax.broadcasted_iota(jnp.int32, (1, hw), 1) % width
        mask_xm1 = xpos >= 1
        mask_xp1 = xpos <= width - 2

        # in_layers: GroupNorm -> SiLU -> Conv3x3(pad=1)
        h = conv3x3(_silu(group_norm(x, g1_ref, be1_ref)),
                    w1_ref, cb1_ref, pad_ref, im_ref, mask_xm1, mask_xp1)

        # emb_layers (hoisted to the wrapper): h = h + emb_out[..., None, None]
        h = h + emb_ref[0]                                   # [Cout, 1] broadcast

        # out_layers: GroupNorm -> SiLU -> Dropout(eval: identity) -> Conv3x3
        # TODO(synk): nn.Dropout is a train-time op; identity in eval mode.
        h = conv3x3(_silu(group_norm(h, g2_ref, be2_ref)),
                    w2_ref, cb2_ref, pad_ref, im_ref, mask_xm1, mask_xp1)

        # skip connection: Identity (out_channels == channels), no 2**-0.5 scale.
        out_ref[0] = (x + h).astype(out_ref.dtype)

    return kernel


# -------------------------------- wrapper -------------------------------------
def resblock_forward(x_nchw, emb, params):
    n, c, height, width = x_nchw.shape
    cout = params["w1"].shape[-1]
    hw = height * width
    assert c % GROUPS == 0 and cout % GROUPS == 0, "GroupNorm32 needs C % 32 == 0"
    # TODO(synk): out_channels != channels (1x1/3x3 skip conv) not implemented.
    assert cout == c, "identity skip path only (out_channels=None)"
    cmax = max(c, cout)

    # NCHW -> [N, C, H*W]: a free reshape; channels on sublanes, spatial on lanes.
    x3 = x_nchw.reshape(n, c, hw)

    # Hoisted emb branch: SiLU -> Linear, precomputed as a per-sample bias column.
    emb_out = (jnp.dot(jax.nn.silu(emb), params["we"]) +
               params["be"]).reshape(n, cout, 1)

    # Conv weights [3, 3, Cin, Cout] (HWIO) -> [Cout, 9*Cin], matching the
    # im2col row ordering (tap-major over (ky, kx), then input channel).
    def flat_w(w_hwio):
        co = w_hwio.shape[-1]
        return jnp.transpose(w_hwio, (3, 0, 1, 2)).reshape(co, -1)

    wf1, wf2 = flat_w(params["w1"]), flat_w(params["w2"])
    col = lambda v: v.reshape(-1, 1)        # [C] -> [C, 1] for lane broadcast

    def full_spec(shape):
        nd = len(shape)
        return pl.BlockSpec(shape, lambda i, _nd=nd: (0,) * _nd)

    grid_spec = pltpu.PrefetchScalarGridSpec(
        num_scalar_prefetch=0,
        grid=(n,),
        in_specs=[
            pl.BlockSpec((1, c, hw), lambda i: (i, 0, 0)),       # x (C x HW)
            pl.BlockSpec((1, cout, 1), lambda i: (i, 0, 0)),     # emb_out
            full_spec((c, 1)), full_spec((c, 1)),                # gn1 gamma/beta
            full_spec((cout, 9 * c)), full_spec((cout, 1)),      # conv1 w/b
            full_spec((cout, 1)), full_spec((cout, 1)),          # gn2 gamma/beta
            full_spec((cout, 9 * cout)), full_spec((cout, 1)),   # conv2 w/b
        ],
        out_specs=pl.BlockSpec((1, cout, hw), lambda i: (i, 0, 0)),
        scratch_shapes=[
            pltpu.VMEM((cmax, 2 * PAD + hw), jnp.float32),       # zero-haloed rows
            pltpu.VMEM((9 * cmax, hw), jnp.float32),             # im2col slab
        ],
    )
    kernel = _make_resblock_kernel(height, width, c, cout, GROUPS)
    out = pl.pallas_call(
        kernel,
        out_shape=jax.ShapeDtypeStruct((n, cout, hw), jnp.float32),
        grid_spec=grid_spec,
        compiler_params=pltpu.CompilerParams(
            dimension_semantics=("parallel",)),
    )(x3, emb_out,
      col(params["gn1_g"]), col(params["gn1_b"]), wf1, col(params["b1"]),
      col(params["gn2_g"]), col(params["gn2_b"]), wf2, col(params["b2"]))
    return out.reshape(n, cout, height, width)


# ------------------------- params + pure-JAX reference ------------------------
def init_params(key):
    ks = jax.random.split(key, 6)
    s = 0.05
    return {
        "gn1_g": jnp.ones((C,), jnp.float32),
        "gn1_b": jnp.zeros((C,), jnp.float32),
        "w1": s * jax.random.normal(ks[0], (3, 3, C, C_OUT), jnp.float32),
        "b1": s * jax.random.normal(ks[1], (C_OUT,), jnp.float32),
        "we": s * jax.random.normal(ks[2], (EMB, C_OUT), jnp.float32),
        "be": s * jax.random.normal(ks[3], (C_OUT,), jnp.float32),
        "gn2_g": jnp.ones((C_OUT,), jnp.float32),
        "gn2_b": jnp.zeros((C_OUT,), jnp.float32),
        # NOTE: the PyTorch module zero-inits this conv (zero_module); we use
        # small nonzero synthetic weights so the kernel path is exercised.
        "w2": s * jax.random.normal(ks[4], (3, 3, C_OUT, C_OUT), jnp.float32),
        "b2": s * jax.random.normal(ks[5], (C_OUT,), jnp.float32),
    }


def ref_forward(x_nchw, emb, p):
    def gn(t, g, b):
        n, c, hh, ww = t.shape
        tg = t.reshape(n, GROUPS, c // GROUPS, hh, ww)
        m = tg.mean(axis=(2, 3, 4), keepdims=True)
        v = ((tg - m) ** 2).mean(axis=(2, 3, 4), keepdims=True)
        tn = ((tg - m) * jax.lax.rsqrt(v + EPS)).reshape(n, c, hh, ww)
        return tn * g.reshape(1, c, 1, 1) + b.reshape(1, c, 1, 1)

    def conv(t, w, b):
        y = jax.lax.conv_general_dilated(
            t, w, window_strides=(1, 1), padding="SAME",
            dimension_numbers=("NCHW", "HWIO", "NCHW"))
        return y + b.reshape(1, -1, 1, 1)

    h = conv(jax.nn.silu(gn(x_nchw, p["gn1_g"], p["gn1_b"])), p["w1"], p["b1"])
    eo = jnp.dot(jax.nn.silu(emb), p["we"]) + p["be"]
    h = h + eo[:, :, None, None]
    h = conv(jax.nn.silu(gn(h, p["gn2_g"], p["gn2_b"])), p["w2"], p["b2"])
    return x_nchw + h                                         # Identity skip


# ---------------------------------- main --------------------------------------
if __name__ == "__main__":
    key = jax.random.PRNGKey(0)
    kx, ke, kp = jax.random.split(key, 3)
    x = jax.random.normal(kx, (N, C, H, W), jnp.float32)
    emb = jax.random.normal(ke, (N, EMB), jnp.float32)
    params = init_params(kp)

    out = jax.block_until_ready(resblock_forward(x, emb, params))
    ref = jax.block_until_ready(ref_forward(x, emb, params))

    assert out.shape == (N, C_OUT, H, W)
    np.testing.assert_allclose(np.asarray(out), np.asarray(ref),
                               rtol=1e-2, atol=1e-2)
    print("KERNEL_OK")
</pallas_src>

<mosaic_0001>
module attributes {stable_mosaic.version = 11 : i64} {
  func.func @kernel(%arg0: i32, %arg1: memref<1x32x256xf32, #tpu.memory_space<vmem>>, %arg2: memref<1x32x1xf32, #tpu.memory_space<vmem>>, %arg3: memref<32x1xf32, #tpu.memory_space<vmem>>, %arg4: memref<32x1xf32, #tpu.memory_space<vmem>>, %arg5: memref<32x288xf32, #tpu.memory_space<vmem>>, %arg6: memref<32x1xf32, #tpu.memory_space<vmem>>, %arg7: memref<32x1xf32, #tpu.memory_space<vmem>>, %arg8: memref<32x1xf32, #tpu.memory_space<vmem>>, %arg9: memref<32x288xf32, #tpu.memory_space<vmem>>, %arg10: memref<32x1xf32, #tpu.memory_space<vmem>>, %arg11: memref<1x32x256xf32, #tpu.memory_space<vmem>>, %arg12: memref<32x512xf32, #tpu.memory_space<vmem>>, %arg13: memref<288x256xf32, #tpu.memory_space<vmem>>) attributes {dimension_semantics = [#tpu.dimension_semantics<parallel>], iteration_bounds = array<i64: 2>, scalar_prefetch = 0 : i64, scratch_operands = 2 : i64, tpu.core_type = #tpu.core_type<tc>, window_params = [{transform_indices = @transform_0, window_bounds = array<i64: 1, 32, 256>}, {transform_indices = @transform_1, window_bounds = array<i64: 1, 32, 1>}, {pipeline_mode = #tpu.pipeline_mode<synchronous>, transform_indices = @transform_2, window_bounds = array<i64: 32, 1>}, {pipeline_mode = #tpu.pipeline_mode<synchronous>, transform_indices = @transform_3, window_bounds = array<i64: 32, 1>}, {pipeline_mode = #tpu.pipeline_mode<synchronous>, transform_indices = @transform_4, window_bounds = array<i64: 32, 288>}, {pipeline_mode = #tpu.pipeline_mode<synchronous>, transform_indices = @transform_5, window_bounds = array<i64: 32, 1>}, {pipeline_mode = #tpu.pipeline_mode<synchronous>, transform_indices = @transform_6, window_bounds = array<i64: 32, 1>}, {pipeline_mode = #tpu.pipeline_mode<synchronous>, transform_indices = @transform_7, window_bounds = array<i64: 32, 1>}, {pipeline_mode = #tpu.pipeline_mode<synchronous>, transform_indices = @transform_8, window_bounds = array<i64: 32, 288>}, {pipeline_mode = #tpu.pipeline_mode<synchronous>, transform_indices = @transform_9, window_bounds = array<i64: 32, 1>}, {transform_indices = @transform_10, window_bounds = array<i64: 1, 32, 256>}]} {
    %c0 = arith.constant 0 : index
    %c0_0 = arith.constant 0 : index
    %c0_1 = arith.constant 0 : index
    %0 = vector.load %arg1[%c0, %c0_0, %c0_1] : memref<1x32x256xf32, #tpu.memory_space<vmem>>, vector<1x32x256xf32>
    %1 = vector.shape_cast %0 : vector<1x32x256xf32> to vector<32x256xf32>
    %cst = arith.constant 0.000000e+00 : f32
    %2 = vector.broadcast %cst : f32 to vector<32x128xf32>
    %c0_2 = arith.constant 0 : index
    %c0_3 = arith.constant 0 : index
    %3 = vector.load %arg12[%c0_2, %c0_3] : memref<32x512xf32, #tpu.memory_space<vmem>>, vector<32x128xf32>
    tpu.vector_store %arg12[%c0_2, %c0_3], %2 {strides = array<i32>} : memref<32x512xf32, #tpu.memory_space<vmem>>, vector<32x128xf32>,
    %c0_4 = arith.constant 0 : index
    %c384 = arith.constant 384 : index
    %4 = vector.load %arg12[%c0_4, %c384] : memref<32x512xf32, #tpu.memory_space<vmem>>, vector<32x128xf32>
    tpu.vector_store %arg12[%c0_4, %c384], %2 {strides = array<i32>} : memref<32x512xf32, #tpu.memory_space<vmem>>, vector<32x128xf32>,
    %5 = tpu.iota {dimensions = array<i32: 1>} : vector<1x256xi32>
    %c16_i32 = arith.constant 16 : i32
    %c0_i32 = arith.constant 0 : i32
    %6 = arith.cmpi eq, %c16_i32, %c0_i32 : i32
    %c1_i32 = arith.constant 1 : i32
    %7 = arith.select %6, %c1_i32, %c16_i32 : i32
    %8 = vector.broadcast %7 : i32 to vector<1x256xi32>
    %9 = arith.remsi %5, %8 : vector<1x256xi32>
    %c0_i32_5 = arith.constant 0 : i32
    %10 = vector.broadcast %c0_i32_5 : i32 to vector<1x256xi32>
    %11 = arith.cmpi ne, %9, %10 : vector<1x256xi32>
    %c0_i32_6 = arith.constant 0 : i32
    %12 = vector.broadcast %c0_i32_6 : i32 to vector<1x256xi32>
    %13 = arith.cmpi slt, %9, %12 : vector<1x256xi32>
    %c0_i32_7 = arith.constant 0 : i32
    %14 = arith.cmpi slt, %7, %c0_i32_7 : i32
    %15 = vector.broadcast %14 : i1 to vector<1x256xi1>
    %16 = vector.broadcast %15 : vector<1x256xi1> to vector<1x256xi1>
    %17 = arith.xori %13, %16 : vector<1x256xi1>
    %18 = arith.andi %17, %11 : vector<1x256xi1>
    %19 = vector.broadcast %7 : i32 to vector<1x256xi32>
    %20 = arith.addi %9, %19 : vector<1x256xi32>
    %21 = arith.select %18, %20, %9 : vector<1x256xi1>, vector<1x256xi32>
    %c1_i32_8 = arith.constant 1 : i32
    %22 = vector.broadcast %c1_i32_8 : i32 to vector<1x256xi32>
    %23 = arith.cmpi sge, %21, %22 : vector<1x256xi32>
    %c14_i32 = arith.constant 14 : i32
    %24 = vector.broadcast %c14_i32 : i32 to vector<1x256xi32>
    %25 = arith.cmpi sle, %21, %24 : vector<1x256xi32>
    %cst_9 = arith.constant dense<0.000000e+00> : vector<32xf32>
    %26 = vector.multi_reduction <add>, %1, %cst_9 [1] : vector<32x256xf32> to vector<32xf32>
    %27 = vector.shape_cast %26 : vector<32xf32> to vector<32x1xf32>
    %cst_10 = arith.constant 2.560000e+02 : f32
    %28 = vector.broadcast %cst_10 : f32 to vector<32x1xf32>
    %29 = arith.divf %27, %28 : vector<32x1xf32>
    %30 = vector.broadcast %29 : vector<32x1xf32> to vector<32x256xf32>
    %31 = arith.subf %1, %30 : vector<32x256xf32>
    %32 = arith.mulf %31, %31 : vector<32x256xf32>
    %cst_11 = arith.constant dense<0.000000e+00> : vector<32xf32>
    %33 = vector.multi_reduction <add>, %32, %cst_11 [1] : vector<32x256xf32> to vector<32xf32>
    %34 = vector.shape_cast %33 : vector<32xf32> to vector<32x1xf32>
    %cst_12 = arith.constant 2.560000e+02 : f32
    %35 = vector.broadcast %cst_12 : f32 to vector<32x1xf32>
    %36 = arith.divf %34, %35 : vector<32x1xf32>
    %cst_13 = arith.constant 9.99999974E-6 : f32
    %37 = vector.broadcast %cst_13 : f32 to vector<32x1xf32>
    %38 = arith.addf %36, %37 : vector<32x1xf32>
    %39 = math.rsqrt %38 : vector<32x1xf32>
    %40 = vector.broadcast %39 : vector<32x1xf32> to vector<32x256xf32>
    %41 = arith.mulf %31, %40 : vector<32x256xf32>
    %c0_14 = arith.constant 0 : index
    %c0_15 = arith.constant 0 : index
    %42 = vector.load %arg3[%c0_14, %c0_15] : memref<32x1xf32, #tpu.memory_space<vmem>>, vector<32x1xf32>
    %43 = vector.broadcast %42 : vector<32x1xf32> to vector<32x256xf32>
    %44 = arith.mulf %41, %43 : vector<32x256xf32>
    %c0_16 = arith.constant 0 : index
    %c0_17 = arith.constant 0 : index
    %45 = vector.load %arg4[%c0_16, %c0_17] : memref<32x1xf32, #tpu.memory_space<vmem>>, vector<32x1xf32>
    %46 = vector.broadcast %45 : vector<32x1xf32> to vector<32x256xf32>
    %47 = arith.addf %44, %46 : vector<32x256xf32>
    %48 = arith.negf %47 : vector<32x256xf32>
    %49 = math.exp %48 : vector<32x256xf32>
    %cst_18 = arith.constant 1.000000e+00 : f32
    %50 = vector.broadcast %cst_18 : f32 to vector<32x256xf32>
    %51 = arith.addf %50, %49 : vector<32x256xf32>
    %52 = arith.divf %50, %51 : vector<32x256xf32>
    %53 = arith.mulf %47, %52 : vector<32x256xf32>
    %c0_19 = arith.constant 0 : index
    %c128 = arith.constant 128 : index
    %54 = vector.load %arg12[%c0_19, %c128] : memref<32x512xf32, #tpu.memory_space<vmem>>, vector<32x256xf32>
    tpu.vector_store %arg12[%c0_19, %c128], %53 {strides = array<i32>} : memref<32x512xf32, #tpu.memory_space<vmem>>, vector<32x256xf32>,
    %c0_20 = arith.constant 0 : index
    %c111 = arith.constant 111 : index
    %55 = vector.load %arg12[%c0_20, %c111] : memref<32x512xf32, #tpu.memory_space<vmem>>, vector<32x256xf32>
    %cst_21 = arith.constant 0.000000e+00 : f32
    %56 = vector.shape_cast %23 : vector<1x256xi1> to vector<1x256xi1>
    %57 = vector.broadcast %56 : vector<1x256xi1> to vector<32x256xi1>
    %58 = vector.broadcast %cst_21 : f32 to vector<32x256xf32>
    %59 = arith.select %57, %55, %58 : vector<32x256xi1>, vector<32x256xf32>
    %c0_22 = arith.constant 0 : index
    %c0_23 = arith.constant 0 : index
    %60 = vector.load %arg13[%c0_22, %c0_23] : memref<288x256xf32, #tpu.memory_space<vmem>>, vector<32x256xf32>
    tpu.vector_store %arg13[%c0_22, %c0_23], %59 {strides = array<i32>} : memref<288x256xf32, #tpu.memory_space<vmem>>, vector<32x256xf32>,
    %c0_24 = arith.constant 0 : index
    %c112 = arith.constant 112 : index
    %61 = vector.load %arg12[%c0_24, %c112] : memref<32x512xf32, #tpu.memory_space<vmem>>, vector<32x256xf32>
    %c32 = arith.constant 32 : index
    %c0_25 = arith.constant 0 : index
    %62 = vector.load %arg13[%c32, %c0_25] : memref<288x256xf32, #tpu.memory_space<vmem>>, vector<32x256xf32>
    tpu.vector_store %arg13[%c32, %c0_25], %61 {strides = array<i32>} : memref<288x256xf32, #tpu.memory_space<vmem>>, vector<32x256xf32>,
    %c0_26 = arith.constant 0 : index
    %c113 = arith.constant 113 : index
    %63 = vector.load %arg12[%c0_26, %c113] : memref<32x512xf32, #tpu.memory_space<vmem>>, vector<32x256xf32>
    %cst_27 = arith.constant 0.000000e+00 : f32
    %64 = vector.shape_cast %25 : vector<1x256xi1> to vector<1x256xi1>
    %65 = vector.broadcast %64 : vector<1x256xi1> to vector<32x256xi1>
    %66 = vector.broadcast %cst_27 : f32 to vector<32x256xf32>
    %67 = arith.select %65, %63, %66 : vector<32x256xi1>, vector<32x256xf32>
    %c64 = arith.constant 64 : index
    %c0_28 = arith.constant 0 : index
    %68 = vector.load %arg13[%c64, %c0_28] : memref<288x256xf32, #tpu.memory_space<vmem>>, vector<32x256xf32>
    tpu.vector_store %arg13[%c64, %c0_28], %67 {strides = array<i32>} : memref<288x256xf32, #tpu.memory_space<vmem>>, vector<32x256xf32>,
    %c0_29 = arith.constant 0 : index
    %c127 = arith.constant 127 : index
    %69 = vector.load %arg12[%c0_29, %c127] : memref<32x512xf32, #tpu.memory_space<vmem>>, vector<32x256xf32>
    %cst_30 = arith.constant 0.000000e+00 : f32
    %70 = vector.shape_cast %23 : vector<1x256xi1> to vector<1x256xi1>
    %71 = vector.broadcast %70 : vector<1x256xi1> to vector<32x256xi1>
    %72 = vector.broadcast %cst_30 : f32 to vector<32x256xf32>
    %73 = arith.select %71, %69, %72 : vector<32x256xi1>, vector<32x256xf32>
    %c96 = arith.constant 96 : index
    %c0_31 = arith.constant 0 : index
    %74 = vector.load %arg13[%c96, %c0_31] : memref<288x256xf32, #tpu.memory_space<vmem>>, vector<32x256xf32>
    tpu.vector_store %arg13[%c96, %c0_31], %73 {strides = array<i32>} : memref<288x256xf32, #tpu.memory_space<vmem>>, vector<32x256xf32>,
    %c0_32 = arith.constant 0 : index
    %c128_33 = arith.constant 128 : index
    %75 = vector.load %arg12[%c0_32, %c128_33] : memref<32x512xf32, #tpu.memory_space<vmem>>, vector<32x256xf32>
    %c128_34 = arith.constant 128 : index
    %c0_35 = arith.constant 0 : index
    %76 = vector.load %arg13[%c128_34, %c0_35] : memref<288x256xf32, #tpu.memory_space<vmem>>, vector<32x256xf32>
    tpu.vector_store %arg13[%c128_34, %c0_35], %75 {strides = array<i32>} : memref<288x256xf32, #tpu.memory_space<vmem>>, vector<32x256xf32>,
    %c0_36 = arith.constant 0 : index
    %c129 = arith.constant 129 : index
    %77 = vector.load %arg12[%c0_36, %c129] : memref<32x512xf32, #tpu.memory_space<vmem>>, vector<32x256xf32>
    %cst_37 = arith.constant 0.000000e+00 : f32
    %78 = vector.shape_cast %25 : vector<1x256xi1> to vector<1x256xi1>
    %79 = vector.broadcast %78 : vector<1x256xi1> to vector<32x256xi1>
    %80 = vector.broadcast %cst_37 : f32 to vector<32x256xf32>
    %81 = arith.select %79, %77, %80 : vector<32x256xi1>, vector<32x256xf32>
    %c160 = arith.constant 160 : index
    %c0_38 = arith.constant 0 : index
    %82 = vector.load %arg13[%c160, %c0_38] : memref<288x256xf32, #tpu.memory_space<vmem>>, vector<32x256xf32>
    tpu.vector_store %arg13[%c160, %c0_38], %81 {strides = array<i32>} : memref<288x256xf32, #tpu.memory_space<vmem>>, vector<32x256xf32>,
    %c0_39 = arith.constant 0 : index
    %c143 = arith.constant 143 : index
    %83 = vector.load %arg12[%c0_39, %c143] : memref<32x512xf32, #tpu.memory_space<vmem>>, vector<32x256xf32>
    %cst_40 = arith.constant 0.000000e+00 : f32
    %84 = vector.shape_cast %23 : vector<1x256xi1> to vector<1x256xi1>
    %85 = vector.broadcast %84 : vector<1x256xi1> to vector<32x256xi1>
    %86 = vector.broadcast %cst_40 : f32 to vector<32x256xf32>
    %87 = arith.select %85, %83, %86 : vector<32x256xi1>, vector<32x256xf32>
    %c192 = arith.constant 192 : index
    %c0_41 = arith.constant 0 : index
    %88 = vector.load %arg13[%c192, %c0_41] : memref<288x256xf32, #tpu.memory_space<vmem>>, vector<32x256xf32>
    tpu.vector_store %arg13[%c192, %c0_41], %87 {strides = array<i32>} : memref<288x256xf32, #tpu.memory_space<vmem>>, vector<32x256xf32>,
    %c0_42 = arith.constant 0 : index
    %c144 = arith.constant 144 : index
    %89 = vector.load %arg12[%c0_42, %c144] : memref<32x512xf32, #tpu.memory_space<vmem>>, vector<32x256xf32>
    %c224 = arith.constant 224 : index
    %c0_43 = arith.constant 0 : index
    %90 = vector.load %arg13[%c224, %c0_43] : memref<288x256xf32, #tpu.memory_space<vmem>>, vector<32x256xf32>
    tpu.vector_store %arg13[%c224, %c0_43], %89 {strides = array<i32>} : memref<288x256xf32, #tpu.memory_space<vmem>>, vector<32x256xf32>,
    %c0_44 = arith.constant 0 : index
    %c145 = arith.constant 145 : index
    %91 = vector.load %arg12[%c0_44, %c145] : memref<32x512xf32, #tpu.memory_space<vmem>>, vector<32x256xf32>
    %cst_45 = arith.constant 0.000000e+00 : f32
    %92 = vector.shape_cast %25 : vector<1x256xi1> to vector<1x256xi1>
    %93 = vector.broadcast %92 : vector<1x256xi1> to vector<32x256xi1>
    %94 = vector.broadcast %cst_45 : f32 to vector<32x256xf32>
    %95 = arith.select %93, %91, %94 : vector<32x256xi1>, vector<32x256xf32>
    %c256 = arith.constant 256 : index
    %c0_46 = arith.constant 0 : index
    %96 = vector.load %arg13[%c256, %c0_46] : memref<288x256xf32, #tpu.memory_space<vmem>>, vector<32x256xf32>
    tpu.vector_store %arg13[%c256, %c0_46], %95 {strides = array<i32>} : memref<288x256xf32, #tpu.memory_space<vmem>>, vector<32x256xf32>,
    %c0_47 = arith.constant 0 : index
    %c0_48 = arith.constant 0 : index
    %97 = vector.load %arg5[%c0_47, %c0_48] : memref<32x288xf32, #tpu.memory_space<vmem>>, vector<32x288xf32>
    %c0_49 = arith.constant 0 : index
    %c0_50 = arith.constant 0 : index
    %98 = vector.load %arg13[%c0_49, %c0_50] : memref<288x256xf32, #tpu.memory_space<vmem>>, vector<288x256xf32>
    %cst_51 = arith.constant dense<0.000000e+00> : vector<32x256xf32>
    %99 = tpu.matmul %97, %98, %cst_51 {dimension_numbers = #tpu.dot_dimension_numbers<[1], [0], [0], [1], [0, 0, 1, 1], [], []>} : vector<32x288xf32>, vector<288x256xf32>, vector<32x256xf32> -> vector<32x256xf32>
    %c0_52 = arith.constant 0 : index
    %c0_53 = arith.constant 0 : index
    %100 = vector.load %arg6[%c0_52, %c0_53] : memref<32x1xf32, #tpu.memory_space<vmem>>, vector<32x1xf32>
    %101 = vector.broadcast %100 : vector<32x1xf32> to vector<32x256xf32>
    %102 = arith.addf %99, %101 : vector<32x256xf32>
    %c0_54 = arith.constant 0 : index
    %c0_55 = arith.constant 0 : index
    %c0_56 = arith.constant 0 : index
    %103 = vector.load %arg2[%c0_54, %c0_55, %c0_56] : memref<1x32x1xf32, #tpu.memory_space<vmem>>, vector<1x32x1xf32>
    %104 = vector.shape_cast %103 : vector<1x32x1xf32> to vector<32x1xf32>
    %105 = vector.broadcast %104 : vector<32x1xf32> to vector<32x256xf32>
    %106 = arith.addf %102, %105 : vector<32x256xf32>
    %cst_57 = arith.constant dense<0.000000e+00> : vector<32xf32>
    %107 = vector.multi_reduction <add>, %106, %cst_57 [1] : vector<32x256xf32> to vector<32xf32>
    %108 = vector.shape_cast %107 : vector<32xf32> to vector<32x1xf32>
    %cst_58 = arith.constant 2.560000e+02 : f32
    %109 = vector.broadcast %cst_58 : f32 to vector<32x1xf32>
    %110 = arith.divf %108, %109 : vector<32x1xf32>
    %111 = vector.broadcast %110 : vector<32x1xf32> to vector<32x256xf32>
    %112 = arith.subf %106, %111 : vector<32x256xf32>
    %113 = arith.mulf %112, %112 : vector<32x256xf32>
    %cst_59 = arith.constant dense<0.000000e+00> : vector<32xf32>
    %114 = vector.multi_reduction <add>, %113, %cst_59 [1] : vector<32x256xf32> to vector<32xf32>
    %115 = vector.shape_cast %114 : vector<32xf32> to vector<32x1xf32>
    %cst_60 = arith.constant 2.560000e+02 : f32
    %116 = vector.broadcast %cst_60 : f32 to vector<32x1xf32>
    %117 = arith.divf %115, %116 : vector<32x1xf32>
    %cst_61 = arith.constant 9.99999974E-6 : f32
    %118 = vector.broadcast %cst_61 : f32 to vector<32x1xf32>
    %119 = arith.addf %117, %118 : vector<32x1xf32>
    %120 = math.rsqrt %119 : vector<32x1xf32>
    %121 = vector.broadcast %120 : vector<32x1xf32> to vector<32x256xf32>
    %122 = arith.mulf %112, %121 : vector<32x256xf32>
    %c0_62 = arith.constant 0 : index
    %c0_63 = arith.constant 0 : index
    %123 = vector.load %arg7[%c0_62, %c0_63] : memref<32x1xf32, #tpu.memory_space<vmem>>, vector<32x1xf32>
    %124 = vector.broadcast %123 : vector<32x1xf32> to vector<32x256xf32>
    %125 = arith.mulf %122, %124 : vector<32x256xf32>
    %c0_64 = arith.constant 0 : index
    %c0_65 = arith.constant 0 : index
    %126 = vector.load %arg8[%c0_64, %c0_65] : memref<32x1xf32, #tpu.memory_space<vmem>>, vector<32x1xf32>
    %127 = vector.broadcast %126 : vector<32x1xf32> to vector<32x256xf32>
    %128 = arith.addf %125, %127 : vector<32x256xf32>
    %129 = arith.negf %128 : vector<32x256xf32>
    %130 = math.exp %129 : vector<32x256xf32>
    %cst_66 = arith.constant 1.000000e+00 : f32
    %131 = vector.broadcast %cst_66 : f32 to vector<32x256xf32>
    %132 = arith.addf %131, %130 : vector<32x256xf32>
    %133 = arith.divf %131, %132 : vector<32x256xf32>
    %134 = arith.mulf %128, %133 : vector<32x256xf32>
    %c0_67 = arith.constant 0 : index
    %c128_68 = arith.constant 128 : index
    %135 = vector.load %arg12[%c0_67, %c128_68] : memref<32x512xf32, #tpu.memory_space<vmem>>, vector<32x256xf32>
    tpu.vector_store %arg12[%c0_67, %c128_68], %134 {strides = array<i32>} : memref<32x512xf32, #tpu.memory_space<vmem>>, vector<32x256xf32>,
    %c0_69 = arith.constant 0 : index
    %c111_70 = arith.constant 111 : index
    %136 = vector.load %arg12[%c0_69, %c111_70] : memref<32x512xf32, #tpu.memory_space<vmem>>, vector<32x256xf32>
    %cst_71 = arith.constant 0.000000e+00 : f32
    %137 = vector.shape_cast %23 : vector<1x256xi1> to vector<1x256xi1>
    %138 = vector.broadcast %137 : vector<1x256xi1> to vector<32x256xi1>
    %139 = vector.broadcast %cst_71 : f32 to vector<32x256xf32>
    %140 = arith.select %138, %136, %139 : vector<32x256xi1>, vector<32x256xf32>
    %c0_72 = arith.constant 0 : index
    %c0_73 = arith.constant 0 : index
    %141 = vector.load %arg13[%c0_72, %c0_73] : memref<288x256xf32, #tpu.memory_space<vmem>>, vector<32x256xf32>
    tpu.vector_store %arg13[%c0_72, %c0_73], %140 {strides = array<i32>} : memref<288x256xf32, #tpu.memory_space<vmem>>, vector<32x256xf32>,
    %c0_74 = arith.constant 0 : index
    %c112_75 = arith.constant 112 : index
    %142 = vector.load %arg12[%c0_74, %c112_75] : memref<32x512xf32, #tpu.memory_space<vmem>>, vector<32x256xf32>
    %c32_76 = arith.constant 32 : index
    %c0_77 = arith.constant 0 : index
    %143 = vector.load %arg13[%c32_76, %c0_77] : memref<288x256xf32, #tpu.memory_space<vmem>>, vector<32x256xf32>
    tpu.vector_store %arg13[%c32_76, %c0_77], %142 {strides = array<i32>} : memref<288x256xf32, #tpu.memory_space<vmem>>, vector<32x256xf32>,
    %c0_78 = arith.constant 0 : index
    %c113_79 = arith.constant 113 : index
    %144 = vector.load %arg12[%c0_78, %c113_79] : memref<32x512xf32, #tpu.memory_space<vmem>>, vector<32x256xf32>
    %cst_80 = arith.constant 0.000000e+00 : f32
    %145 = vector.shape_cast %25 : vector<1x256xi1> to vector<1x256xi1>
    %146 = vector.broadcast %145 : vector<1x256xi1> to vector<32x256xi1>
    %147 = vector.broadcast %cst_80 : f32 to vector<32x256xf32>
    %148 = arith.select %146, %144, %147 : vector<32x256xi1>, vector<32x256xf32>
    %c64_81 = arith.constant 64 : index
    %c0_82 = arith.constant 0 : index
    %149 = vector.load %arg13[%c64_81, %c0_82] : memref<288x256xf32, #tpu.memory_space<vmem>>, vector<32x256xf32>
    tpu.vector_store %arg13[%c64_81, %c0_82], %148 {strides = array<i32>} : memref<288x256xf32, #tpu.memory_space<vmem>>, vector<32x256xf32>,
    %c0_83 = arith.constant 0 : index
    %c127_84 = arith.constant 127 : index
    %150 = vector.load %arg12[%c0_83, %c127_84] : memref<32x512xf32, #tpu.memory_space<vmem>>, vector<32x256xf32>
    %cst_85 = arith.constant 0.000000e+00 : f32
    %151 = vector.shape_cast %23 : vector<1x256xi1> to vector<1x256xi1>
    %152 = vector.broadcast %151 : vector<1x256xi1> to vector<32x256xi1>
    %153 = vector.broadcast %cst_85 : f32 to vector<32x256xf32>
    %154 = arith.select %152, %150, %153 : vector<32x256xi1>, vector<32x256xf32>
    %c96_86 = arith.constant 96 : index
    %c0_87 = arith.constant 0 : index
    %155 = vector.load %arg13[%c96_86, %c0_87] : memref<288x256xf32, #tpu.memory_space<vmem>>, vector<32x256xf32>
    tpu.vector_store %arg13[%c96_86, %c0_87], %154 {strides = array<i32>} : memref<288x256xf32, #tpu.memory_space<vmem>>, vector<32x256xf32>,
    %c0_88 = arith.constant 0 : index
    %c128_89 = arith.constant 128 : index
    %156 = vector.load %arg12[%c0_88, %c128_89] : memref<32x512xf32, #tpu.memory_space<vmem>>, vector<32x256xf32>
    %c128_90 = arith.constant 128 : index
    %c0_91 = arith.constant 0 : index
    %157 = vector.load %arg13[%c128_90, %c0_91] : memref<288x256xf32, #tpu.memory_space<vmem>>, vector<32x256xf32>
    tpu.vector_store %arg13[%c128_90, %c0_91], %156 {strides = array<i32>} : memref<288x256xf32, #tpu.memory_space<vmem>>, vector<32x256xf32>,
    %c0_92 = arith.constant 0 : index
    %c129_93 = arith.constant 129 : index
    %158 = vector.load %arg12[%c0_92, %c129_93] : memref<32x512xf32, #tpu.memory_space<vmem>>, vector<32x256xf32>
    %cst_94 = arith.constant 0.000000e+00 : f32
    %159 = vector.shape_cast %25 : vector<1x256xi1> to vector<1x256xi1>
    %160 = vector.broadcast %159 : vector<1x256xi1> to vector<32x256xi1>
    %161 = vector.broadcast %cst_94 : f32 to vector<32x256xf32>
    %162 = arith.select %160, %158, %161 : vector<32x256xi1>, vector<32x256xf32>
    %c160_95 = arith.constant 160 : index
    %c0_96 = arith.constant 0 : index
    %163 = vector.load %arg13[%c160_95, %c0_96] : memref<288x256xf32, #tpu.memory_space<vmem>>, vector<32x256xf32>
    tpu.vector_store %arg13[%c160_95, %c0_96], %162 {strides = array<i32>} : memref<288x256xf32, #tpu.memory_space<vmem>>, vector<32x256xf32>,
    %c0_97 = arith.constant 0 : index
    %c143_98 = arith.constant 143 : index
    %164 = vector.load %arg12[%c0_97, %c143_98] : memref<32x512xf32, #tpu.memory_space<vmem>>, vector<32x256xf32>
    %cst_99 = arith.constant 0.000000e+00 : f32
    %165 = vector.shape_cast %23 : vector<1x256xi1> to vector<1x256xi1>
    %166 = vector.broadcast %165 : vector<1x256xi1> to vector<32x256xi1>
    %167 = vector.broadcast %cst_99 : f32 to vector<32x256xf32>
    %168 = arith.select %166, %164, %167 : vector<32x256xi1>, vector<32x256xf32>
    %c192_100 = arith.constant 192 : index
    %c0_101 = arith.constant 0 : index
    %169 = vector.load %arg13[%c192_100, %c0_101] : memref<288x256xf32, #tpu.memory_space<vmem>>, vector<32x256xf32>
    tpu.vector_store %arg13[%c192_100, %c0_101], %168 {strides = array<i32>} : memref<288x256xf32, #tpu.memory_space<vmem>>, vector<32x256xf32>,
    %c0_102 = arith.constant 0 : index
    %c144_103 = arith.constant 144 : index
    %170 = vector.load %arg12[%c0_102, %c144_103] : memref<32x512xf32, #tpu.memory_space<vmem>>, vector<32x256xf32>
    %c224_104 = arith.constant 224 : index
    %c0_105 = arith.constant 0 : index
    %171 = vector.load %arg13[%c224_104, %c0_105] : memref<288x256xf32, #tpu.memory_space<vmem>>, vector<32x256xf32>
    tpu.vector_store %arg13[%c224_104, %c0_105], %170 {strides = array<i32>} : memref<288x256xf32, #tpu.memory_space<vmem>>, vector<32x256xf32>,
    %c0_106 = arith.constant 0 : index
    %c145_107 = arith.constant 145 : index
    %172 = vector.load %arg12[%c0_106, %c145_107] : memref<32x512xf32, #tpu.memory_space<vmem>>, vector<32x256xf32>
    %cst_108 = arith.constant 0.000000e+00 : f32
    %173 = vector.shape_cast %25 : vector<1x256xi1> to vector<1x256xi1>
    %174 = vector.broadcast %173 : vector<1x256xi1> to vector<32x256xi1>
    %175 = vector.broadcast %cst_108 : f32 to vector<32x256xf32>
    %176 = arith.select %174, %172, %175 : vector<32x256xi1>, vector<32x256xf32>
    %c256_109 = arith.constant 256 : index
    %c0_110 = arith.constant 0 : index
    %177 = vector.load %arg13[%c256_109, %c0_110] : memref<288x256xf32, #tpu.memory_space<vmem>>, vector<32x256xf32>
    tpu.vector_store %arg13[%c256_109, %c0_110], %176 {strides = array<i32>} : memref<288x256xf32, #tpu.memory_space<vmem>>, vector<32x256xf32>,
    %c0_111 = arith.constant 0 : index
    %c0_112 = arith.constant 0 : index
    %178 = vector.load %arg9[%c0_111, %c0_112] : memref<32x288xf32, #tpu.memory_space<vmem>>, vector<32x288xf32>
    %c0_113 = arith.constant 0 : index
    %c0_114 = arith.constant 0 : index
    %179 = vector.load %arg13[%c0_113, %c0_114] : memref<288x256xf32, #tpu.memory_space<vmem>>, vector<288x256xf32>
    %cst_115 = arith.constant dense<0.000000e+00> : vector<32x256xf32>
    %180 = tpu.matmul %178, %179, %cst_115 {dimension_numbers = #tpu.dot_dimension_numbers<[1], [0], [0], [1], [0, 0, 1, 1], [], []>} : vector<32x288xf32>, vector<288x256xf32>, vector<32x256xf32> -> vector<32x256xf32>
    %c0_116 = arith.constant 0 : index
    %c0_117 = arith.constant 0 : index
    %181 = vector.load %arg10[%c0_116, %c0_117] : memref<32x1xf32, #tpu.memory_space<vmem>>, vector<32x1xf32>
    %182 = vector.broadcast %181 : vector<32x1xf32> to vector<32x256xf32>
    %183 = arith.addf %180, %182 : vector<32x256xf32>
    %184 = arith.addf %1, %183 : vector<32x256xf32>
    %c0_118 = arith.constant 0 : index
    %c0_119 = arith.constant 0 : index
    %c0_120 = arith.constant 0 : index
    %185 = vector.load %arg11[%c0_118, %c0_119, %c0_120] : memref<1x32x256xf32, #tpu.memory_space<vmem>>, vector<1x32x256xf32>
    %186 = vector.shape_cast %185 : vector<1x32x256xf32> to vector<32x256xf32>
    %187 = vector.shape_cast %184 : vector<32x256xf32> to vector<1x32x256xf32>
    tpu.vector_store %arg11[%c0_118, %c0_119, %c0_120], %187 {strides = array<i32>} : memref<1x32x256xf32, #tpu.memory_space<vmem>>, vector<1x32x256xf32>,
    return
  }
  func.func @transform_0(%arg0: i32) -> (i32, i32, i32) {
    %c0_i32 = arith.constant 0 : i32
    %c0_i32_0 = arith.constant 0 : i32
    %c0_i32_1 = arith.constant 0 : i32
    return %arg0, %c0_i32, %c0_i32_0 : i32, i32, i32
  }
  func.func @transform_1(%arg0: i32) -> (i32, i32, i32) {
    %c0_i32 = arith.constant 0 : i32
    %c0_i32_0 = arith.constant 0 : i32
    %c0_i32_1 = arith.constant 0 : i32
    return %arg0, %c0_i32, %c0_i32_0 : i32, i32, i32
  }
  func.func @transform_2(%arg0: i32) -> (i32, i32) {
    %c0_i32 = arith.constant 0 : i32
    %c0_i32_0 = arith.constant 0 : i32
    %c0_i32_1 = arith.constant 0 : i32
    return %c0_i32, %c0_i32_0 : i32, i32
  }
  func.func @transform_3(%arg0: i32) -> (i32, i32) {
    %c0_i32 = arith.constant 0 : i32
    %c0_i32_0 = arith.constant 0 : i32
    %c0_i32_1 = arith.constant 0 : i32
    return %c0_i32, %c0_i32_0 : i32, i32
  }
  func.func @transform_4(%arg0: i32) -> (i32, i32) {
    %c0_i32 = arith.constant 0 : i32
    %c0_i32_0 = arith.constant 0 : i32
    %c0_i32_1 = arith.constant 0 : i32
    return %c0_i32, %c0_i32_0 : i32, i32
  }
  func.func @transform_5(%arg0: i32) -> (i32, i32) {
    %c0_i32 = arith.constant 0 : i32
    %c0_i32_0 = arith.constant 0 : i32
    %c0_i32_1 = arith.constant 0 : i32
    return %c0_i32, %c0_i32_0 : i32, i32
  }
  func.func @transform_6(%arg0: i32) -> (i32, i32) {
    %c0_i32 = arith.constant 0 : i32
    %c0_i32_0 = arith.constant 0 : i32
    %c0_i32_1 = arith.constant 0 : i32
    return %c0_i32, %c0_i32_0 : i32, i32
  }
  func.func @transform_7(%arg0: i32) -> (i32, i32) {
    %c0_i32 = arith.constant 0 : i32
    %c0_i32_0 = arith.constant 0 : i32
    %c0_i32_1 = arith.constant 0 : i32
    return %c0_i32, %c0_i32_0 : i32, i32
  }
  func.func @transform_8(%arg0: i32) -> (i32, i32) {
    %c0_i32 = arith.constant 0 : i32
    %c0_i32_0 = arith.constant 0 : i32
    %c0_i32_1 = arith.constant 0 : i32
    return %c0_i32, %c0_i32_0 : i32, i32
  }
  func.func @transform_9(%arg0: i32) -> (i32, i32) {
    %c0_i32 = arith.constant 0 : i32
    %c0_i32_0 = arith.constant 0 : i32
    %c0_i32_1 = arith.constant 0 : i32
    return %c0_i32, %c0_i32_0 : i32, i32
  }
  func.func @transform_10(%arg0: i32) -> (i32, i32, i32) {
    %c0_i32 = arith.constant 0 : i32
    %c0_i32_0 = arith.constant 0 : i32
    %c0_i32_1 = arith.constant 0 : i32
    return %arg0, %c0_i32, %c0_i32_0 : i32, i32, i32
  }
}

</mosaic_0001>

<bundles_post_ra>
// kernel: tpu_custom_call.1
= control target key start
LH: loop header
LB: loop body
LE: loop exit
PB: predicated region body
PF: predicated region fallthrough
CT: control target
= control target key end

     0   :  { %s4996_s0 = inlined_call_operand.vmem [shape: f32[2,32,256], index: 0, kind: input, shape index: {}]   ;;  %s4997_s1 = inlined_call_operand.vmem [shape: f32[2,32,1], index: 1, kind: input, shape index: {}]   ;;  %s4998_s2 = inlined_call_operand.vmem [shape: f32[32,1], index: 2, kind: input, shape index: {}]   ;;  %s4999_s3 = inlined_call_operand.vmem [shape: f32[32,1], index: 3, kind: input, shape index: {}]   ;;  %s5000_s4 = inlined_call_operand.vmem [shape: f32[32,288], index: 4, kind: input, shape index: {}]   ;;  %s5001_s5 = inlined_call_operand.vmem [shape: f32[32,1], index: 5, kind: input, shape index: {}]   ;;  %s5002_s6 = inlined_call_operand.vmem [shape: f32[32,1], index: 6, kind: input, shape index: {}]   ;;  %s5003_s7 = inlined_call_operand.vmem [shape: f32[32,1], index: 7, kind: input, shape index: {}]   ;;  %s5004_s8 = inlined_call_operand.hbm [shape: f32[32,288], index: 8, kind: input, shape index: {}]   ;;  %s5005_s9 = inlined_call_operand.vmem [shape: f32[32,1], index: 9, kind: input, shape index: {}]   ;;  %s5006_s10 = inlined_call_operand.hbm [shape: f32[2,32,256], index: 10, kind: output, shape index: {}]  }
   0x1   :  { %5024 = sst [smem:[#allocation10_spill]] %s4996_s0 }
   0x2   :  { %15 = vsyncpa [#allocation5], 0 }
   0x3   :  { %16 = vsyncpa [#allocation6], 0 }
   0x4   :  { %18 = vsyncpa [#allocation6 + $0x1], 0  ;;  %s4028_s13 = smov 0   ;;  %s4030_s14 = smov 0  }
   0x5   :  { %s4032_s15 = smov 0   ;;  %s4034_s16 = smov 0  }
   0x6 LB: > { %s4049_s17 = sadd.s32 4294967295, %s3956_s16   ;;  %s2866_s18 = sadd.s32 4294967294, %s3956_s16   ;;  %s3956_s16 = sphi %s4034_s16, %s5053_s16   ;;  %s3952_s15 = sphi %s4032_s15, %s5052_s15   ;;  %s3948_s14 = sphi %s4030_s14, %s5051_s14   ;;  %s3944_s13 = sphi %s4028_s13, %s5050_s13  }
   0x7   : > { %s4053_s19 = sadd.s32 1, %s3956_s16   ;;  %s251_s20 = sadd.s32 1, %s3952_s15 }
   0x8   : > { %s248_s21 = ssub.s32 %s3956_s16, %s4053_s19  ;;  %p261_p0 = scmp.ne.s32.totalorder %s3952_s15, %s3948_s14 }
   0x9   : > { %p249_p1 = scmp.eq.s32.totalorder %s248_s21, 0  ;;  %p262_p2 = scmp.eq.s32.totalorder %s4049_s17, 1 }
   0xa   : > { %p267_p3 = scmp.ne.s32.totalorder %s3948_s14, %s3944_s13  ;;  %p268_p4 = scmp.eq.s32.totalorder %s2866_s18, 1 }
   0xb   : > { %s4064_s22 = scalar_select %p249_p1, %s3952_s15, %s251_s20  }
   0xc   : > { %p4066_p5 = por %p262_p2, %p261_p0  ;;  %p4070_p6 = por %p268_p4, %p267_p3 }
   0xd   : > { %p2867_p7 = scmp.ge.s32.totalorder %s3956_s16, 1  ;;  %p275_p8 = scmp.lt.s32.totalorder %s3956_s16, 3 }
   0xe   : > { %s5025_s23 = scalar_select %p4066_p5, 1, 0 }
   0xf   : > { %s5026_s24 = scalar_select %p4070_p6, 1, 0 }
  0x10   : > { %p5007_p9 = scmp.eq.s32.totalorder %s4049_s17, 0  ;;  %p4077_p10 = pnand %p2867_p7, %p275_p8 }
  0x11   : > { %s3958_s26 = smov [#allocation4]   ;;  %s3862_s11 = scalar_lea.hbm %s5004_s8, 1536 }
  0x12   : > { %s5027_s25 = scalar_select %p4077_p10, 1, 0 }
  0x13   : > { %s305_s27 = sshll.u32 %s3958_s26, 4  ;;  %p3235_p11 = pneg %p4077_p10  ;;  %s306_s27 = int_to_ptr.vmem [resolvable:$true] %s305_s27 }
  0x14   : > { %p3863_p13 = scmp.ne.s32.totalorder %s5004_s8, %s3862_s11  ;;  %p3869_p3 = scmp.lt.u32.totalorder %s3862_s11, %s5004_s8 }
  0x15   : > { %p4085_p12 = pnand %p5007_p9, %p3235_p11 }
  0x17   : > { %p3864_p0 = pneg %p4085_p12 }
  0x19   : > { %p3865_p1 = pnand %p3864_p0, %p3863_p13 }
  0x1b   : > { %p3866_p2 = pneg %p3865_p1 }
  0x1d   : > { %p3871_p4 = pnand %p3869_p3, %p3866_p2 }
  0x1f   : > { %3874 = shalt.err (!%p3871_p4)
}
  0x20   : > { %s3875_s26 = scalar_lea.vmem %s306_s27, 1536  ;;  %p3883_p9 = scmp.lt.s32.totalorder %s306_s27, %s306_s27 }
  0x21   : > { %p3876_p7 = scmp.ne.s32.totalorder %s306_s27, %s3875_s26  ;;  %p3884_p6 = scmp.lt.s32.totalorder %s3875_s26, %s3875_s26 }
  0x23   : > { %p3878_p8 = pnand %p3876_p7, %p3864_p0  ;;  %p3885_p5 = por %p3884_p6, %p3883_p9 }
  0x25   : > { %p3879_p11 = pneg %p3878_p8 }
  0x27   : > { %p3886_p10 = pnand %p3885_p5, %p3879_p11 }
  0x29   : > { %3889 = shalt.err (!%p3886_p10)
}
  0x2a   : > { %s3959_s29 = smov 384   ;;  %s3960_s30 = smov 24  }
  0x2b   : > { %3238 = dma.hbm_to_vmem [thread:$0]  (!%p4085_p12), %s5004_s8, 1536, %s306_s27, [#allocation5], %s3959_s29, %s3959_s29, %s3960_s30  }
  0x2c   : > { %p5029_p13 = scmp.ne.s32.totalorder %s5027_s25, 0 }
  0x2d   : > { %p5030_p1 = scmp.eq.s32.totalorder (!%p5029_p13), %s4049_s17, 0 }
  0x2e   : > { %340 = sbr.rel (%p5029_p13) target bundleno = 1707 (0x6ab), region = 60 }
  0x35   : > { %3935 = dma.done.wait (%p5030_p1), [#allocation5], 1536   ;;  %p5031_p0 = pmov %p5030_p1 }
  0x36   : > { %p383_p5 = scmp.lt.s32.totalorder %s4049_s17, 1  ;;  %s5032_s0 = sld [smem:[#allocation10_spill]]  ;;  %v3961_v12 = vmov 0   ;;  %v506_v34 = vld [vmem:[%s4998_s2 + $0x8] sm:$0xff]  ;;  %v537_v35 = vld [vmem:[%s4999_s3] sm:$0xff]  ;;  %v507_v38 = vld [vmem:[%s4998_s2 + $0x10] sm:$0xff] }
  0x37   : > { %3937 = vsyncadd (%p5031_p0), [#allocation5], 4294965760  ;;  %3293 = vset.pattern.permute.xlu1 %v3961_v12  ;;  %3292 = vset.pattern.permute.xlu0 %v3961_v12  ;;  %v505_v36 = vld [vmem:[%s4998_s2] sm:$0xff]  ;;  %v538_v37 = vld [vmem:[%s4999_s3 + $0x8] sm:$0xff]  ;;  %v3962_v41 = vmov 0.0   ;;  %s5016_s12 = smov 17  }
  0x38   : > { %s4113_s11 = scalar_select %p383_p5, %s4049_s17, 1  ;;  %v508_v39 = vld [vmem:[%s4998_s2 + $0x18] sm:$0xff]  ;;  %v539_v40 = vld [vmem:[%s4999_s3 + $0x10] sm:$0xff]  ;;  %vm685_vm0 = vcmask 138240   ;;  %vm766_vm5 = vcmask 130048   ;;  %vm843_vm6 = vcmask 121856  }
  0x39   : > { %s5014_s18 = smov 16   ;;  %v540_v49 = vld [vmem:[%s4999_s3 + $0x18] sm:$0xff]  ;;  %s3967_s25 = smov 127   ;;  %vm924_vm11 = vcmask 7168   ;;  %vm1021_vm12 = vcmask 1039360   ;;  %vm1102_vm13 = vcmask 924672  }
  0x3a   : > { %s2906_s28 = sshll.u32 %s4113_s11, 6  ;;  %s5022_s26 = smov 113   ;;  %vm1183_vm14 = vcmask 916480   ;;  %vm1256_vm15 = vcmask 908288  }
  0x3b   : > { %s5020_s29 = smov 112   ;;  %s5018_s30 = smov 111  }
  0x3c   : > { %s4119_s27 = scalar_lea.vmem %s5032_s0, %s2906_s28  ;;  %s5012_s0 = smov 15  }
  0x3d   : > { %v393_v0 = vld [vmem:[%s4119_s27] sm:$0xff]  ;;  %v394_v1 = vld [vmem:[%s4119_s27 + $0x8] sm:$0xff]  ;;  %v395_v5 = vld [vmem:[%s4119_s27 + $0x10] sm:$0xff]  ;;  %s5010_s28 = smov 1   ;;  %s2907_s20 = sshll.u32 %s4113_s11, 5 }
  0x3e   : > { %v397_v2 = vld [vmem:[%s4119_s27 + $0x20] sm:$0xff]  ;;  %v440_v3 = vadd.f32 %v394_v1, %v393_v0  ;;  %v398_v4 = vld [vmem:[%s4119_s27 + $0x28] sm:$0xff]  ;;  %v396_v6 = vld [vmem:[%s4119_s27 + $0x18] sm:$0xff]  ;;  %s5041_s21 = smov 17   ;;  %s5042_s11 = smov 16  }
  0x3f   : > { %v446_v7 = vadd.f32 %v398_v4, %v397_v2  ;;  %v399_v8 = vld [vmem:[%s4119_s27 + $0x30] sm:$0xff]  ;;  %v400_v9 = vld [vmem:[%s4119_s27 + $0x38] sm:$0xff]  ;;  %v443_v10 = vadd.f32 %v396_v6, %v395_v5  ;;  %p5048_p9 = scmp.ne.s32.totalorder %s5025_s23, 0 }
  0x40   : > { %441 = vadd.xlane.f32.xlu0 %v440_v3  ;;  %v449_v11 = vadd.f32 %v400_v9, %v399_v8 }
  0x41   : > { %447 = vadd.xlane.f32.xlu1 %v446_v7 }
  0x44   : > { %444 = vadd.xlane.f32.xlu0 %v443_v10 }
  0x45   : > { %450 = vadd.xlane.f32.xlu1 %v449_v11 }
  0xcd   : > { %v442_v13 = vpop.xlane.xlu0 %441 }
  0xce   : > { %v453_v14 = vmul.f32 0.00390625, %v442_v13  ;;  %v448_v15 = vpop.xlane.xlu1 %447 }
  0xcf   : > { %v455_v16 = vmul.f32 0.00390625, %v448_v15 }
  0xd0   : > { %v4129_v17 = vsub.f32 %v393_v0, %v453_v14  ;;  %v4131_v18 = vsub.f32 %v394_v1, %v453_v14 }
  0xd1   : > { %v4133_v19 = vsub.f32 %v397_v2, %v455_v16  ;;  %v4135_v20 = vsub.f32 %v398_v4, %v455_v16  ;;  %v445_v21 = vpop.xlane.xlu0 %444 }
  0xd2   : > { %v454_v22 = vmul.f32 0.00390625, %v445_v21  ;;  %v465_v23 = vmul.f32 %v4129_v17, %v4129_v17  ;;  %v466_v24 = vmul.f32 %v4131_v18, %v4131_v18  ;;  %v451_v42 = vpop.xlane.xlu1 %450 }
  0xd3   : > { %v469_v25 = vmul.f32 %v4133_v19, %v4133_v19  ;;  %v470_v26 = vmul.f32 %v4135_v20, %v4135_v20  ;;  %v456_v43 = vmul.f32 0.00390625, %v451_v42 }
  0xd4   : > { %v4145_v27 = vsub.f32 %v395_v5, %v454_v22  ;;  %v4147_v28 = vsub.f32 %v396_v6, %v454_v22  ;;  %v473_v29 = vadd.f32 %v466_v24, %v465_v23 }
  0xd5   : > { %v479_v30 = vadd.f32 %v470_v26, %v469_v25  ;;  %v4180_v44 = vsub.f32 %v399_v8, %v456_v43  ;;  %v4182_v45 = vsub.f32 %v400_v9, %v456_v43 }
  0xd6   : > { %474 = vadd.xlane.f32.xlu0 %v473_v29  ;;  %v467_v31 = vmul.f32 %v4145_v27, %v4145_v27  ;;  %v468_v32 = vmul.f32 %v4147_v28, %v4147_v28 }
  0xd7   : > { %v471_v46 = vmul.f32 %v4180_v44, %v4180_v44  ;;  %v472_v47 = vmul.f32 %v4182_v45, %v4182_v45 }
  0xd8   : > { %v476_v33 = vadd.f32 %v468_v32, %v467_v31 }
  0xd9   : > { %v482_v48 = vadd.f32 %v472_v47, %v471_v46 }
  0xda   : > { %480 = vadd.xlane.f32.xlu0 %v479_v30  ;;  %477 = vadd.xlane.f32.xlu1 %v476_v33 }
  0xeb   : > { %516 = vperm.xlu1 %3293, %v506_v34  }
  0xef   : > { %543 = vperm.xlu1 %3293, %v537_v35  }
  0xf0   : > { %511 = vperm.xlu0 %3292, %v505_v36  }
  0xf3   : > { %548 = vperm.xlu1 %3293, %v538_v37  }
  0xf4   : > { %3300 = vrot.lane.b32.xlu0 %v3962_v41, %s5016_s12 }
  0xf7   : > { %521 = vperm.xlu1 %3293, %v507_v38  }
  0xf8   : > { %3310 = vrot.lane.b32.xlu0 %v3962_v41, %s5014_s18 }
  0xfb   : > { %526 = vperm.xlu1 %3293, %v508_v39  }
  0xfc   : > { %3320 = vrot.lane.b32.xlu0 %v3962_v41, %s5012_s0 }
  0xff   : > { %553 = vperm.xlu1 %3293, %v539_v40  }
 0x100   : > { %3330 = vrot.lane.b32.xlu0 %v3962_v41, %s5010_s28 }
 0x123   : > { %483 = vadd.xlane.f32.xlu1 %v482_v48 }
 0x134   : > { %558 = vperm.xlu1 %3293, %v540_v49  }
 0x138   : > { %3295 = vrot.lane.b32.xlu1 %v3962_v41, %s5016_s12 }
 0x13c   : > { %3305 = vrot.lane.b32.xlu1 %v3962_v41, %s5014_s18 }
 0x140   : > { %3315 = vrot.lane.b32.xlu1 %v3962_v41, %s5012_s0 }
 0x144   : > { %3325 = vrot.lane.b32.xlu1 %v3962_v41, %s5010_s28 }
 0x163   : > { %v475_v50 = vpop.xlane.xlu0 %474 }
 0x164   : > { %v485_v51 = vmul.f32 0.00390625, %v475_v50 }
 0x166   : > { %v489_v52 = vadd.f32 1e-05, %v485_v51 }
 0x167   : > { %v478_v53 = vpop.xlane.xlu1 %477  ;;  %v481_v54 = vpop.xlane.xlu0 %480 }
 0x168   : > { %3774 = vrsqrt.f32 %v489_v52  ;;  %v486_v55 = vmul.f32 0.00390625, %v478_v53  ;;  %v487_v56 = vmul.f32 0.00390625, %v481_v54 }
 0x16a   : > { %v490_v57 = vadd.f32 1e-05, %v486_v55  ;;  %v491_v58 = vadd.f32 1e-05, %v487_v56 }
 0x16b   : > { %v517_v59 = vpop.permute.xlu1 %516 }
 0x16c   : > { %3776 = vrsqrt.f32 %v490_v57 }
 0x16d   : > { %3778 = vrsqrt.f32 %v491_v58 }
 0x16f   : > { %v544_v60 = vpop.permute.xlu1 %543  ;;  %v512_v62 = vpop.permute.xlu0 %511 }
 0x172   : > { %v3775_v61 = vpop.eup %3774 }
 0x173   : > { %v549_v63 = vpop.permute.xlu1 %548  ;;  %v497_v0 = vmul.f32 %v3775_v61, %v4129_v17  ;;  %v498_v1 = vmul.f32 %v3775_v61, %v4131_v18 }
 0x175   : > { %v529_v2 = vmul.f32 %v512_v62, %v497_v0  ;;  %v530_v3 = vmul.f32 %v512_v62, %v498_v1 }
 0x176   : > { %v3777_v4 = vpop.eup %3776 }
 0x177   : > { %v3779_v5 = vpop.eup %3778  ;;  %v499_v6 = vmul.f32 %v3777_v4, %v4145_v27  ;;  %v500_v7 = vmul.f32 %v3777_v4, %v4147_v28  ;;  %v561_v8 = vadd.f32 %v544_v60, %v529_v2  ;;  %v562_v9 = vadd.f32 %v544_v60, %v530_v3  ;;  %v522_v10 = vpop.permute.xlu1 %521 }
 0x178   : > { %v501_v15 = vmul.f32 %v3779_v5, %v4133_v19  ;;  %v502_v16 = vmul.f32 %v3779_v5, %v4135_v20 }
 0x179   : > { %v531_v11 = vmul.f32 %v517_v59, %v499_v6  ;;  %v532_v12 = vmul.f32 %v517_v59, %v500_v7  ;;  %v2877_v13 = vmul.f32 -1.442695, %v561_v8  ;;  %v2878_v14 = vmul.f32 -1.442695, %v562_v9 }
 0x17a   : > { %v533_v24 = vmul.f32 %v522_v10, %v501_v15  ;;  %v534_v25 = vmul.f32 %v522_v10, %v502_v16 }
 0x17b   : > { %v563_v17 = vadd.f32 %v549_v63, %v531_v11  ;;  %v564_v18 = vadd.f32 %v549_v63, %v532_v12  ;;  %3780 = vpow2.f32 %v2877_v13  ;;  %v4207_v21 = vpop.permute.xlu1 %526 }
 0x17c   : > { %3782 = vpow2.f32 %v2878_v14 }
 0x17d   : > { %v2879_v22 = vmul.f32 -1.442695, %v563_v17  ;;  %v2880_v23 = vmul.f32 -1.442695, %v564_v18 }
 0x17f   : > { %3784 = vpow2.f32 %v2879_v22  ;;  %v554_v26 = vpop.permute.xlu1 %553 }
 0x180   : > { %3786 = vpow2.f32 %v2880_v23  ;;  %v565_v27 = vadd.f32 %v554_v26, %v533_v24  ;;  %v566_v28 = vadd.f32 %v554_v26, %v534_v25  ;;  %v4277_v24 = vpop.permute.xlu0 %3300 }
 0x182   : > { %v2881_v29 = vmul.f32 -1.442695, %v565_v27  ;;  %v2882_v30 = vmul.f32 -1.442695, %v566_v28 }
 0x184   : > { %3788 = vpow2.f32 %v2881_v29  ;;  %v4285_v26 = vpop.permute.xlu0 %3310 }
 0x185   : > { %v3781_v19 = vpop.eup %3780  ;;  %3790 = vpow2.f32 %v2882_v30 }
 0x186   : > { %v3783_v20 = vpop.eup %3782  ;;  %v593_v31 = vadd.f32 1.0, %v3781_v19 }
 0x187   : > { %v594_v32 = vadd.f32 1.0, %v3783_v20 }
 0x188   : > { %3792 = vrcp.f32 %v593_v31  ;;  %v4294_v30 = vpop.permute.xlu0 %3320 }
 0x189   : > { %v3785_v33 = vpop.eup %3784  ;;  %3794 = vrcp.f32 %v594_v32 }
 0x18a   : > { %v3787_v34 = vpop.eup %3786  ;;  %v595_v35 = vadd.f32 1.0, %v3785_v33 }
 0x18b   : > { %v596_v36 = vadd.f32 1.0, %v3787_v34  ;;  %v1374_v34 = vld [vmem:[%s5001_s5 + $0x8] sm:$0xff] }
 0x18c   : > { %3796 = vrcp.f32 %v595_v35  ;;  %v4310_v33 = vpop.permute.xlu0 %3330 }
 0x18d   : > { %3798 = vrcp.f32 %v596_v36 }
 0x18e   : > { %v3789_v37 = vpop.eup %3788 }
 0x18f   : > { %v3791_v38 = vpop.eup %3790  ;;  %v597_v39 = vadd.f32 1.0, %v3789_v37 }
 0x190   : > { %v598_v40 = vadd.f32 1.0, %v3791_v38 }
 0x191   : > { %3800 = vrcp.f32 %v597_v39 }
 0x192   : > { %v3793_v42 = vpop.eup %3792  ;;  %3802 = vrcp.f32 %v598_v40 }
 0x193   : > { %v3795_v43 = vpop.eup %3794  ;;  %v4209_v46 = vmul.f32 %v3793_v42, %v561_v8 }
 0x194   : > { %v4211_v47 = vmul.f32 %v3795_v43, %v562_v9 }
 0x196   : > { %v3797_v48 = vpop.eup %3796  ;;  %v4215_v49 = vpack.i.bf16 %v4211_v47, %v4209_v46  ;;  %v3414_v29 = vpack.i.bf16 %v3962_v41, %v4211_v47 }
 0x197   : > { %v3799_v50 = vpop.eup %3798  ;;  %v4217_v51 = vmul.f32 %v3797_v48, %v563_v17 }
 0x198   : > { %v4219_v52 = vmul.f32 %v3799_v50, %v564_v18  ;;  %3335 = vrot.lane.b32.xlu1 %v4215_v49, %s5016_s12 }
 0x199   : > { %v4225_v53 = vpack.i.bf16 %v4217_v51, %v4209_v46  ;;  %v3051_v59 = vpack.c.bf16 %v4217_v51, %v4209_v46 }
 0x19a   : > { %v3339_v54 = vpack.i.bf16 %v4219_v52, %v4217_v51  ;;  %v3049_v58 = vpack.c.bf16 %v4219_v52, %v4211_v47  ;;  %v3419_v1 = vpack.i.bf16 %v3962_v41, %v4219_v52 }
 0x19b   : > { %v3801_v55 = vpop.eup %3800 }
 0x19c   : > { %v3803_v56 = vpop.eup %3802  ;;  %v4229_v57 = vmul.f32 %v3801_v55, %v565_v27  ;;  %3340 = vrot.lane.b32.xlu0 %v3339_v54, %s5016_s12 }
 0x19d   : > { %v4236_v60 = vmul.f32 %v3803_v56, %v566_v28  ;;  %v409_v28 = vlaneseq }
 0x19f   : > { %v3344_v61 = vpack.i.bf16 %v4236_v60, %v4229_v57  ;;  %v3429_v3 = vpack.i.bf16 %v3962_v41, %v4236_v60  ;;  %v4296_v19 = vand.u32 127, %v409_v28 }
 0x1a1   : > { %3345 = vrot.lane.b32.xlu0 %v3344_v61, %s5016_s12  ;;  %v4304_v31 = vadd.s32 128, %v4296_v19  ;;  %v416_v37 = vand.u32 15, %v4296_v19  ;;  %v2454_v19 = vld [vmem:[#allocation4 + $0x10] sm:$0xff] }
 0x1a3   : > { %v423_v36 = vand.u32 15, %v4304_v31  ;;  %vm436_vm2 = vcmp.ge.s32.totalorder %v416_v37, 1  ;;  %vm438_vm8 = vcmp.le.s32.totalorder %v416_v37, 14 }
 0x1a4   : > { %vm4342_vm4 = vmpackc.low %vm436_vm2, %vm436_vm2 }
 0x1a5   : > { %3360 = vrot.lane.b32.xlu0 %v3339_v54, %s5014_s18  ;;  %vm437_vm1 = vcmp.ge.s32.totalorder %v423_v36, 1  ;;  %vm439_vm7 = vcmp.le.s32.totalorder %v423_v36, 14  ;;  %vm4426_vm10 = vmpackc.low %vm438_vm8, %vm438_vm8 }
 0x1a6   : > { %vm4333_vm3 = vmpackc.low %vm437_vm1, %vm437_vm1  ;;  %vm1397_vm1 = vcmask 261120  }
 0x1a7   : > { %vm4422_vm9 = vmpackc.low %vm439_vm7, %vm439_vm7 }
 0x1a9   : > { %3365 = vrot.lane.b32.xlu0 %v3344_v61, %s5014_s18 }
 0x1ad   : > { %3380 = vrot.lane.b32.xlu0 %v3339_v54, %s5012_s0 }
 0x1b0   : > { %v484_v62 = vpop.xlane.xlu1 %483 }
 0x1b1   : > { %v488_v63 = vmul.f32 0.00390625, %v484_v62  ;;  %3385 = vrot.lane.b32.xlu0 %v3344_v61, %s5012_s0 }
 0x1b3   : > { %v492_v0 = vadd.f32 1e-05, %v488_v63 }
 0x1b4   : > { %v559_v8 = vpop.permute.xlu1 %558 }
 0x1b5   : > { %3804 = vrsqrt.f32 %v492_v0  ;;  %3400 = vrot.lane.b32.xlu0 %v3339_v54, %s5010_s28 }
 0x1b8   : > { %v3296_v23 = vpop.permute.xlu1 %3295 }
 0x1b9   : > { %3405 = vrot.lane.b32.xlu0 %v3344_v61, %s5010_s28  ;;  %v3298_v38 = vunpack.i.h.bf16 %v3296_v23  ;;  %v3297_v39 = vunpack.i.l.bf16 %v3296_v23  ;;  %v1376_v61 = vld [vmem:[%s5001_s5 + $0x18] sm:$0xff] }
 0x1bc   : > { %v4280_v25 = vpop.permute.xlu1 %3305 }
 0x1bd   : > { %3420 = vrot.lane.b32.xlu0 %v3419_v1, %s3967_s25  ;;  %v3308_v28 = vunpack.i.h.bf16 %v4280_v25 }
 0x1bf   : > { %v3805_v2 = vpop.eup %3804 }
 0x1c0   : > { %v503_v4 = vmul.f32 %v3805_v2, %v4180_v44  ;;  %v504_v5 = vmul.f32 %v3805_v2, %v4182_v45  ;;  %v4288_v27 = vpop.permute.xlu1 %3315 }
 0x1c1   : > { %3430 = vrot.lane.b32.xlu0 %v3429_v3, %s3967_s25 }
 0x1c2   : > { %v535_v6 = vmul.f32 %v4207_v21, %v503_v4  ;;  %v536_v7 = vmul.f32 %v4207_v21, %v504_v5  ;;  %v1290_v4 = vld [vmem:[%s5000_s4 + $0x8] sm:$0xff]  ;;  %v1373_v5 = vld [vmem:[%s5001_s5] sm:$0xff] }
 0x1c3   : > { %1474 = vmatprep.mubr.f32.mxu0 %v1290_v4 }
 0x1c4   : > { %v567_v9 = vadd.f32 %v559_v8, %v535_v6  ;;  %v568_v10 = vadd.f32 %v559_v8, %v536_v7  ;;  %v4299_v20 = vpop.permute.xlu1 %3325  ;;  %v1375_v8 = vld [vmem:[%s5001_s5 + $0x10] sm:$0xff] }
 0x1c6   : > { %v2883_v11 = vmul.f32 -1.442695, %v567_v9  ;;  %v2884_v12 = vmul.f32 -1.442695, %v568_v10 }
 0x1c8   : > { %3806 = vpow2.f32 %v2883_v11 }
 0x1c9   : > { %3808 = vpow2.f32 %v2884_v12 }
 0x1d2   : > { %v3807_v13 = vpop.eup %3806 }
 0x1d3   : > { %v3809_v14 = vpop.eup %3808  ;;  %v599_v15 = vadd.f32 1.0, %v3807_v13 }
 0x1d4   : > { %v600_v16 = vadd.f32 1.0, %v3809_v14 }
 0x1d5   : > { %3810 = vrcp.f32 %v599_v15  ;;  %v3302_v15 = vunpack.i.l.bf16 %v4277_v24 }
 0x1d6   : > { %3812 = vrcp.f32 %v600_v16 }
 0x1df   : > { %v3811_v44 = vpop.eup %3810 }
 0x1e0   : > { %v3813_v45 = vpop.eup %3812  ;;  %v4257_v17 = vmul.f32 %v3811_v44, %v567_v9 }
 0x1e1   : > { %v4259_v18 = vmul.f32 %v3813_v45, %v568_v10 }
 0x1e2   : > { %v3439_v21 = vpack.i.bf16 %v4257_v17, %v4229_v57 }
 0x1e3   : > { %v3349_v22 = vpack.i.bf16 %v4259_v18, %v4257_v17  ;;  %v3434_v32 = vpack.i.bf16 %v3962_v41, %v4259_v18 }
 0x1e4   : > { %3440 = vrot.lane.b32.xlu0 %v3439_v21, %s3967_s25 }
 0x1e5   : > { %3350 = vrot.lane.b32.xlu1 %v3349_v22, %s5016_s12  ;;  %s4319_s12 = scalar_lea.vmem %s4997_s1, %s2907_s20 }
 0x1e6   : > { %v1589_v43 = vld [vmem:[%s4319_s12 + $0x8] sm:$0xff]  ;;  %v1588_v7 = vld [vmem:[%s4319_s12] sm:$0xff]  ;;  %v1590_v10 = vld [vmem:[%s4319_s12 + $0x10] sm:$0xff] }
 0x1e8   : > { %3450 = vrot.lane.b32.xlu0 %v3419_v1, %s5022_s26 }
 0x1e9   : > { %3355 = vrot.lane.b32.xlu1 %v4215_v49, %s5014_s18 }
 0x1ec   : > { %3460 = vrot.lane.b32.xlu0 %v3429_v3, %s5022_s26 }
 0x1ed   : > { %3370 = vrot.lane.b32.xlu1 %v3349_v22, %s5014_s18  ;;  %s5043_s18 = smov 15  }
 0x1f0   : > { %3470 = vrot.lane.b32.xlu0 %v3439_v21, %s5022_s26 }
 0x1f1   : > { %3375 = vrot.lane.b32.xlu1 %v4215_v49, %s5012_s0 }
 0x1f4   : > { %3480 = vrot.lane.b32.xlu0 %v3419_v1, %s5020_s29 }
 0x1f5   : > { %3390 = vrot.lane.b32.xlu1 %v3349_v22, %s5012_s0  ;;  %s5045_s0 = smov 113  }
 0x1f8   : > { %3490 = vrot.lane.b32.xlu0 %v3429_v3, %s5020_s29 }
 0x1f9   : > { %3395 = vrot.lane.b32.xlu1 %v4215_v49, %s5010_s28 }
 0x1fc   : > { %3500 = vrot.lane.b32.xlu0 %v3439_v21, %s5020_s29 }
 0x1fd   : > { %3410 = vrot.lane.b32.xlu1 %v3349_v22, %s5010_s28  ;;  %s5046_s28 = smov 112  }
 0x200   : > { %3510 = vrot.lane.b32.xlu0 %v3419_v1, %s5018_s30 }
 0x201   : > { %3415 = vrot.lane.b32.xlu1 %v3414_v29, %s3967_s25 }
 0x204   : > { %3520 = vrot.lane.b32.xlu0 %v3429_v3, %s5018_s30  ;;  %v1591_v3 = vld [vmem:[%s4319_s12 + $0x18] sm:$0xff]  ;;  %s5044_s12 = smov 1  }
 0x205   : > { %3425 = vrot.lane.b32.xlu1 %v4225_v53, %s3967_s25 }
 0x208   : > { %3530 = vrot.lane.b32.xlu0 %v3439_v21, %s5018_s30  ;;  %v3303_v21 = vunpack.i.h.bf16 %v4277_v24 }
 0x209   : > { %3435 = vrot.lane.b32.xlu1 %v3434_v32, %s3967_s25 }
 0x20a   : > { %v3336_v35 = vpop.permute.xlu1 %3335 }
 0x20b   : > { %v3338_v40 = vunpack.i.h.bf16 %v3336_v35  ;;  %v3337_v42 = vunpack.i.l.bf16 %v3336_v35 }
 0x20c   : > { %1384 = vperm.xlu0 %3292, %v1374_v34  }
 0x20d   : > { %3445 = vrot.lane.b32.xlu1 %v3414_v29, %s5022_s26  ;;  %v687_v54 = vsel %vm685_vm0, %v3337_v42, %v3338_v40  ;;  %v686_v62 = vsel %vm685_vm0, %v3297_v39, %v3337_v42 }
 0x20e   : > { %v3341_v48 = vpop.permute.xlu0 %3340 }
 0x20f   : > { %v3343_v49 = vunpack.i.h.bf16 %v3341_v48  ;;  %v3342_v50 = vunpack.i.l.bf16 %v3341_v48  ;;  %v3307_v48 = vunpack.i.l.bf16 %v4280_v25 }
 0x210   : > { %1599 = vperm.xlu0 %3292, %v1589_v43  }
 0x211   : > { %3455 = vrot.lane.b32.xlu1 %v4225_v53, %s5022_s26  ;;  %v689_v55 = vsel %vm685_vm0, %v3342_v50, %v3343_v49  ;;  %v688_v63 = vsel %vm685_vm0, %v3298_v38, %v3342_v50 }
 0x212   : > { %v3005_v0 = vpack.c.bf16 %v689_v55, %v687_v54  ;;  %v3008_v1 = vpack.c.bf16 %v688_v63, %v686_v62  ;;  %v3312_v54 = vunpack.i.l.bf16 %v4285_v26 }
 0x213   : > { %v3346_v6 = vpop.permute.xlu0 %3345 }
 0x214   : > { %3007 = vmatprep.subr.msk.bf16.mxu0 %vm4333_vm3, %v3005_v0  ;;  %1394 = vperm.xlu0 %3292, %v1376_v61   ;;  %v3348_v16 = vunpack.i.h.bf16 %v3346_v6  ;;  %v3347_v44 = vunpack.i.l.bf16 %v3346_v6 }
 0x215   : > { %3465 = vrot.lane.b32.xlu1 %v3434_v32, %s5022_s26  ;;  %3010 = vmatpush1.bf16.msk.msra.mxu0 %vm4342_vm4, %v3008_v1  ;;  %s5047_s26 = smov 111  }
 0x216   : > { %v690_v34 = vsel %vm685_vm0, %v3302_v15, %v3347_v44  ;;  %v691_v35 = vsel %vm685_vm0, %v3347_v44, %v3348_v16 }
 0x217   : > { %v3361_v9 = vpop.permute.xlu0 %3360 }
 0x218   : > { %1609 = vperm.xlu0 %3292, %v1591_v3  }
 0x219   : > { %3475 = vrot.lane.b32.xlu1 %v3414_v29, %s5020_s29 }
 0x21b   : > { %v3366_v11 = vpop.permute.xlu0 %3365 }
 0x21c   : > { %v3368_v62 = vunpack.i.h.bf16 %v3366_v11  ;;  %v3367_v63 = vunpack.i.l.bf16 %v3366_v11 }
 0x21d   : > { %3485 = vrot.lane.b32.xlu1 %v4225_v53, %s5020_s29 }
 0x21e   : > { %v772_v15 = vsel %vm766_vm5, %v3367_v63, %v3368_v62  ;;  %v771_v44 = vsel %vm766_vm5, %v3312_v54, %v3367_v63 }
 0x221   : > { %3495 = vrot.lane.b32.xlu1 %v3434_v32, %s5020_s29 }
 0x225   : > { %3505 = vrot.lane.b32.xlu1 %v3414_v29, %s5018_s30  ;;  %v3363_v29 = vunpack.i.h.bf16 %v3361_v9 }
 0x229   : > { %3515 = vrot.lane.b32.xlu1 %v4225_v53, %s5018_s30  ;;  %v4371_v53 = vpop.permute.xlu0 %3380 }
 0x22d   : > { %3525 = vrot.lane.b32.xlu1 %v3434_v32, %s5018_s30  ;;  %v4373_v12 = vpop.permute.xlu0 %3385  ;;  %v3362_v32 = vunpack.i.l.bf16 %v3361_v9  ;;  %v3383_v9 = vunpack.i.h.bf16 %v4371_v53  ;;  %s2908_s30 = sshll.u32 %s4049_s17, 10 }
 0x22e   : > { %v3387_v31 = vunpack.i.l.bf16 %v4373_v12 }
 0x22f   : > { %v770_v55 = vsel %vm766_vm5, %v3362_v32, %v3363_v29  ;;  %v769_v61 = vsel %vm766_vm5, %v3308_v28, %v3362_v32  ;;  %v3322_v29 = vunpack.i.l.bf16 %v4294_v30 }
 0x231   : > { %1379 = vperm.xlu1 %3293, %v1373_v5   ;;  %v4375_v13 = vpop.permute.xlu0 %3400  ;;  %v3313_v5 = vunpack.i.h.bf16 %v4285_v26 }
 0x232   : > { %v3402_v54 = vunpack.i.l.bf16 %v4375_v13 }
 0x235   : > { %1594 = vperm.xlu1 %3293, %v1588_v7   ;;  %v4377_v14 = vpop.permute.xlu0 %3405 }
 0x239   : > { %1389 = vperm.xlu1 %3293, %v1375_v8   ;;  %v4386_v40 = vpop.permute.xlu0 %3420  ;;  %v3318_v8 = vunpack.i.h.bf16 %v4288_v27 }
 0x23d   : > { %1604 = vperm.xlu1 %3293, %v1590_v10   ;;  %v3382_v10 = vunpack.i.l.bf16 %v4371_v53  ;;  %v4402_v11 = vpop.permute.xlu0 %3430  ;;  %v3317_v53 = vunpack.i.l.bf16 %v4288_v27 }
 0x23e   : > { %v3432_v47 = vunpack.i.l.bf16 %v4402_v11 }
 0x23f   : > { %v846_v32 = vsel %vm843_vm6, %v3318_v8, %v3382_v10  ;;  %v3408_v8 = vunpack.i.h.bf16 %v4377_v14 }
 0x257   : > { %v3351_v45 = vpop.permute.xlu1 %3350 }
 0x258   : > { %v3353_v22 = vunpack.i.h.bf16 %v3351_v45  ;;  %v3352_v23 = vunpack.i.l.bf16 %v3351_v45 }
 0x25a   : > { %v692_v38 = vsel %vm685_vm0, %v3303_v21, %v3352_v23  ;;  %v693_v39 = vsel %vm685_vm0, %v3352_v23, %v3353_v22 }
 0x25b   : > { %v3356_v42 = vpop.permute.xlu1 %3355  ;;  %v3011_v43 = vpack.c.bf16 %v693_v39, %v691_v35  ;;  %v3014_v24 = vpack.c.bf16 %v692_v38, %v690_v34  ;;  %v847_v34 = vsel %vm843_vm6, %v3382_v10, %v3383_v9  ;;  %v4416_v35 = vpop.permute.xlu0 %3440  ;;  %v3388_v38 = vunpack.i.h.bf16 %v4373_v12 }
 0x25c   : > { %v3358_v49 = vunpack.i.h.bf16 %v3356_v42  ;;  %v3357_v50 = vunpack.i.l.bf16 %v3356_v42  ;;  %v3407_v9 = vunpack.i.l.bf16 %v4377_v14 }
 0x25d   : > { %3013 = vmatprep.subr.msk.bf16.mxu0 %vm4333_vm3, %v3011_v43  ;;  %v2460_v43 = vld [vmem:[#allocation4 + $0x40] sm:$0xff] }
 0x25e   : > { %3016 = vmatpush1.bf16.msk.msra.mxu0 %vm4342_vm4, %v3014_v24  ;;  %v768_v0 = vsel %vm766_vm5, %v3357_v50, %v3358_v49  ;;  %v767_v25 = vsel %vm766_vm5, %v3307_v48, %v3357_v50  ;;  %v3323_v24 = vunpack.i.h.bf16 %v4294_v30  ;;  %v3328_v49 = vunpack.i.h.bf16 %v4299_v20 }
 0x25f   : > { %v3371_v1 = vpop.permute.xlu1 %3370  ;;  %v3017_v3 = vpack.c.bf16 %v770_v55, %v768_v0  ;;  %v3019_v4 = vpack.c.bf16 %v769_v61, %v767_v25  ;;  %v3403_v50 = vunpack.i.h.bf16 %v4375_v13  ;;  %v848_v55 = vsel %vm843_vm6, %v3322_v29, %v3387_v31  ;;  %v4442_v63 = vpop.permute.xlu0 %3450 }
 0x260   : > { %v3373_v6 = vunpack.i.h.bf16 %v3371_v1  ;;  %v3372_v7 = vunpack.i.l.bf16 %v3371_v1  ;;  %v849_v61 = vsel %vm843_vm6, %v3387_v31, %v3388_v38  ;;  %v3327_v13 = vunpack.i.l.bf16 %v4299_v20 }
 0x261   : > { %3018 = vmatprep.subr.bf16.mxu0 %v3017_v3 }
 0x262   : > { %3020 = vmatpush1.bf16.msra.mxu0 %v3019_v4  ;;  %v774_v16 = vsel %vm766_vm5, %v3372_v7, %v3373_v6  ;;  %v773_v26 = vsel %vm766_vm5, %v3313_v5, %v3372_v7  ;;  %v3332_v5 = vunpack.i.l.bf16 %v4310_v33  ;;  %v927_v6 = vsel %vm924_vm11, %v3328_v49, %v3402_v54 }
 0x263   : > { %v3376_v45 = vpop.permute.xlu1 %3375  ;;  %v3021_v21 = vpack.c.bf16 %v774_v16, %v772_v15  ;;  %v3023_v22 = vpack.c.bf16 %v773_v26, %v771_v44  ;;  %v928_v7 = vsel %vm924_vm11, %v3402_v54, %v3403_v50  ;;  %v3333_v26 = vunpack.i.h.bf16 %v4310_v33 }
 0x264   : > { %v3378_v23 = vunpack.i.h.bf16 %v3376_v45  ;;  %v3377_v28 = vunpack.i.l.bf16 %v3376_v45  ;;  %v929_v14 = vsel %vm924_vm11, %v3332_v5, %v3407_v9  ;;  %v3055_v50 = vpack.c.bf16 %v4257_v17, %v4229_v57 }
 0x265   : > { %3022 = vmatprep.subr.bf16.mxu0 %v3021_v21  ;;  %v3443_v54 = vunpack.i.h.bf16 %v4416_v35  ;;  %v3452_v57 = vunpack.i.l.bf16 %v4442_v63 }
 0x266   : > { %v844_v27 = vsel %vm843_vm6, %v3317_v53, %v3377_v28  ;;  %v845_v36 = vsel %vm843_vm6, %v3377_v28, %v3378_v23  ;;  %3024 = vmatpush1.bf16.msra.mxu0 %v3023_v22  ;;  %v4457_v22 = vpop.permute.xlu0 %3460  ;;  %v930_v53 = vsel %vm924_vm11, %v3407_v9, %v3408_v8 }
 0x267   : > { %v3391_v37 = vpop.permute.xlu1 %3390  ;;  %v3025_v39 = vpack.c.bf16 %v847_v34, %v845_v36  ;;  %v3028_v42 = vpack.c.bf16 %v846_v32, %v844_v27  ;;  %v3423_v36 = vunpack.i.h.bf16 %v4386_v40  ;;  %v3463_v8 = vunpack.i.h.bf16 %v4457_v22 }
 0x268   : > { %v3393_v48 = vunpack.i.h.bf16 %v3391_v37  ;;  %v3392_v12 = vunpack.i.l.bf16 %v3391_v37  ;;  %v3422_v37 = vunpack.i.l.bf16 %v4386_v40  ;;  %v3462_v9 = vunpack.i.l.bf16 %v4457_v22 }
 0x269   : > { %3027 = vmatprep.subr.msk.bf16.mxu0 %vm4422_vm9, %v3025_v39 }
 0x26a   : > { %v850_v62 = vsel %vm843_vm6, %v3323_v24, %v3392_v12  ;;  %v851_v30 = vsel %vm843_vm6, %v3392_v12, %v3393_v48  ;;  %3030 = vmatpush1.bf16.msk.msra.mxu0 %vm4426_vm10, %v3028_v42  ;;  %v4471_v31 = vpop.permute.xlu0 %3470  ;;  %v3053_v24 = vpack.c.bf16 %v4259_v18, %v4236_v60  ;;  %v3433_v12 = vunpack.i.h.bf16 %v4402_v11 }
 0x26b   : > { %v3396_v0 = vpop.permute.xlu1 %3395  ;;  %v3031_v25 = vpack.c.bf16 %v851_v30, %v849_v61  ;;  %v3034_v1 = vpack.c.bf16 %v850_v62, %v848_v55  ;;  %v3442_v55 = vunpack.i.l.bf16 %v4416_v35  ;;  %v3453_v61 = vunpack.i.h.bf16 %v4442_v63 }
 0x26c   : > { %v3398_v3 = vunpack.i.h.bf16 %v3396_v0  ;;  %v3397_v4 = vunpack.i.l.bf16 %v3396_v0  ;;  %v1027_v11 = vsel %vm1021_vm12, %v3432_v47, %v3433_v12  ;;  %v1108_v22 = vsel %vm1102_vm13, %v3462_v9, %v3463_v8 }
 0x26d   : > { %3033 = vmatprep.subr.msk.bf16.mxu0 %vm4422_vm9, %v3031_v25  ;;  %v1026_v35 = vsel %vm1021_vm12, %v3442_v55, %v3432_v47  ;;  %v1106_v63 = vsel %vm1102_vm13, %v3452_v57, %v3453_v61 }
 0x26e   : > { %v925_v10 = vsel %vm924_vm11, %v3327_v13, %v3397_v4  ;;  %v926_v15 = vsel %vm924_vm11, %v3397_v4, %v3398_v3  ;;  %3036 = vmatpush1.bf16.msk.msra.mxu0 %vm4426_vm10, %v3034_v1  ;;  %v4489_v60 = vpop.permute.xlu0 %3480 }
 0x26f   : > { %v3411_v20 = vpop.permute.xlu1 %3410  ;;  %v3037_v16 = vpack.c.bf16 %v928_v7, %v926_v15  ;;  %v3040_v44 = vpack.c.bf16 %v927_v6, %v925_v10  ;;  %v3472_v10 = vunpack.i.l.bf16 %v4471_v31 }
 0x270   : > { %v3413_v45 = vunpack.i.h.bf16 %v3411_v20  ;;  %v3412_v21 = vunpack.i.l.bf16 %v3411_v20 }
 0x271   : > { %3039 = vmatprep.subr.msk.bf16.mxu0 %vm4333_vm3, %v3037_v16 }
 0x272   : > { %v931_v23 = vsel %vm924_vm11, %v3333_v26, %v3412_v21  ;;  %v932_v28 = vsel %vm924_vm11, %v3412_v21, %v3413_v45  ;;  %3042 = vmatpush1.bf16.msk.msra.mxu0 %vm4342_vm4, %v3040_v44  ;;  %v3491_v3 = vpop.permute.xlu0 %3490  ;;  %v3473_v45 = vunpack.i.h.bf16 %v4471_v31 }
 0x273   : > { %v3416_v29 = vpop.permute.xlu1 %3415  ;;  %v3043_v33 = vpack.c.bf16 %v932_v28, %v930_v53  ;;  %v3046_v32 = vpack.c.bf16 %v931_v23, %v929_v14  ;;  %v1107_v53 = vsel %vm1102_vm13, %v3472_v10, %v3462_v9  ;;  %v3483_v28 = vunpack.i.h.bf16 %v4489_v60 }
 0x274   : > { %v3418_v34 = vunpack.i.h.bf16 %v3416_v29  ;;  %v3417_v38 = vunpack.i.l.bf16 %v3416_v29  ;;  %v3482_v29 = vunpack.i.l.bf16 %v4489_v60 }
 0x275   : > { %3045 = vmatprep.subr.msk.bf16.mxu0 %vm4333_vm3, %v3043_v33 }
 0x276   : > { %3048 = vmatpush1.bf16.msk.msra.mxu0 %vm4342_vm4, %v3046_v32  ;;  %v1023_v48 = vsel %vm1021_vm12, %v3417_v38, %v3418_v34  ;;  %v3501_v23 = vpop.permute.xlu0 %3500 }
 0x277   : > { %v3426_v27 = vpop.permute.xlu1 %3425  ;;  %3050 = vmatprep.subr.bf16.mxu0 %v3049_v58  ;;  %v1025_v58 = vsel %vm1021_vm12, %v3422_v37, %v3423_v36 }
 0x278   : > { %v3428_v39 = vunpack.i.h.bf16 %v3426_v27  ;;  %v3427_v42 = vunpack.i.l.bf16 %v3426_v27  ;;  %v3057_v51 = vpack.c.bf16 %v1025_v58, %v1023_v48  ;;  %v3492_v58 = vunpack.i.l.bf16 %v3491_v3 }
 0x27a   : > { %3052 = vmatpush1.bf16.msra.mxu0 %v3051_v59  ;;  %v1022_v18 = vsel %vm1021_vm12, %v3427_v42, %v3417_v38  ;;  %v1024_v46 = vsel %vm1021_vm12, %v3428_v39, %v3422_v37  ;;  %v1187_v39 = vsel %vm1183_vm14, %v3482_v29, %v3483_v28  ;;  %v3511_v42 = vpop.permute.xlu0 %3510 }
 0x27b   : > { %v3436_v52 = vpop.permute.xlu1 %3435  ;;  %3054 = vmatprep.subr.bf16.mxu0 %v3053_v24  ;;  %v3060_v17 = vpack.c.bf16 %v1024_v46, %v1022_v18  ;;  %v3503_v46 = vunpack.i.h.bf16 %v3501_v23  ;;  %v3513_v61 = vunpack.i.h.bf16 %v3511_v42 }
 0x27c   : > { %v3438_v40 = vunpack.i.h.bf16 %v3436_v52  ;;  %v3437_v49 = vunpack.i.l.bf16 %v3436_v52  ;;  %v3493_v52 = vunpack.i.h.bf16 %v3491_v3 }
 0x27e   : > { %v1029_v59 = vsel %vm1021_vm12, %v3437_v49, %v3438_v40  ;;  %3056 = vmatpush1.bf16.msra.mxu0 %v3055_v50  ;;  %v1028_v25 = vsel %vm1021_vm12, %v3443_v54, %v3437_v49  ;;  %v3502_v40 = vunpack.i.l.bf16 %v3501_v23  ;;  %v1189_v54 = vsel %vm1183_vm14, %v3492_v58, %v3493_v52 }
 0x27f   : > { %v3446_v62 = vpop.permute.xlu1 %3445  ;;  %3059 = vmatprep.subr.msk.bf16.mxu0 %vm4422_vm9, %v3057_v51  ;;  %v3063_v1 = vpack.c.bf16 %v1029_v59, %v1027_v11  ;;  %v3066_v5 = vpack.c.bf16 %v1028_v25, %v1026_v35  ;;  %v3521_v11 = vpop.permute.xlu0 %3520 }
 0x280   : > { %v3448_v30 = vunpack.i.h.bf16 %v3446_v62  ;;  %v3447_v0 = vunpack.i.l.bf16 %v3446_v62  ;;  %v1188_v55 = vsel %vm1183_vm14, %v3502_v40, %v3492_v58  ;;  %v3512_v62 = vunpack.i.l.bf16 %v3511_v42  ;;  %v1297_v42 = vld [vmem:[%s5000_s4 + $0x40] sm:$0xff] }
 0x281   : > { %v3523_v10 = vunpack.i.h.bf16 %v3521_v11 }
 0x282   : > { %v1104_v13 = vsel %vm1102_vm13, %v3447_v0, %v3448_v30  ;;  %3062 = vmatpush1.bf16.msk.msra.mxu0 %vm4426_vm10, %v3060_v17  ;;  %v1260_v35 = vsel %vm1256_vm15, %v3512_v62, %v3513_v61 }
 0x283   : > { %v3456_v4 = vpop.permute.xlu1 %3455  ;;  %3065 = vmatprep.subr.msk.bf16.mxu0 %vm4422_vm9, %v3063_v1  ;;  %v3069_v15 = vpack.c.bf16 %v1106_v63, %v1104_v13  ;;  %v3531_v63 = vpop.permute.xlu0 %3530 }
 0x284   : > { %v3458_v6 = vunpack.i.h.bf16 %v3456_v4  ;;  %v3457_v7 = vunpack.i.l.bf16 %v3456_v4  ;;  %v1289_v4 = vld [vmem:[%s5000_s4] sm:$0xff] }
 0x286   : > { %v1103_v20 = vsel %vm1102_vm13, %v3457_v7, %v3447_v0  ;;  %v1105_v16 = vsel %vm1102_vm13, %v3458_v6, %v3452_v57  ;;  %3068 = vmatpush1.bf16.msk.msra.mxu0 %vm4426_vm10, %v3066_v5  ;;  %v1293_v7 = vld [vmem:[%s5000_s4 + $0x20] sm:$0xff] }
 0x287   : > { %v3072_v44 = vpack.c.bf16 %v1105_v16, %v1103_v20  ;;  %v3466_v26 = vpop.permute.xlu1 %3465  ;;  %3071 = vmatprep.subr.msk.bf16.mxu0 %vm4333_vm3, %v3069_v15  ;;  %v3522_v15 = vunpack.i.l.bf16 %v3521_v11  ;;  %v3532_v20 = vunpack.i.l.bf16 %v3531_v63 }
 0x288   : > { %v3468_v21 = vunpack.i.h.bf16 %v3466_v26  ;;  %v3467_v14 = vunpack.i.l.bf16 %v3466_v26  ;;  %v1292_v26 = vld [vmem:[%s5000_s4 + $0x18] sm:$0xff] }
 0x289   : > { %v1262_v28 = vsel %vm1256_vm15, %v3522_v15, %v3523_v10 }
 0x28a   : > { %v1109_v33 = vsel %vm1102_vm13, %v3473_v45, %v3467_v14  ;;  %v1110_v32 = vsel %vm1102_vm13, %v3467_v14, %v3468_v21  ;;  %3074 = vmatpush1.bf16.msk.msra.mxu0 %vm4342_vm4, %v3072_v44  ;;  %v1296_v14 = vld [vmem:[%s5000_s4 + $0x38] sm:$0xff] }
 0x28b   : > { %v3075_v34 = vpack.c.bf16 %v1110_v32, %v1108_v22  ;;  %v3078_v38 = vpack.c.bf16 %v1109_v33, %v1107_v53  ;;  %v3476_v31 = vpop.permute.xlu1 %3475  ;;  %v3533_v22 = vunpack.i.h.bf16 %v3531_v63 }
 0x28c   : > { %v3478_v27 = vunpack.i.h.bf16 %v3476_v31  ;;  %v3477_v36 = vunpack.i.l.bf16 %v3476_v31 }
 0x28d   : > { %3077 = vmatprep.subr.msk.bf16.mxu0 %vm4333_vm3, %v3075_v34  ;;  %v1295_v34 = vld [vmem:[%s5000_s4 + $0x30] sm:$0xff] }
 0x28e   : > { %3080 = vmatpush1.bf16.msk.msra.mxu0 %vm4342_vm4, %v3078_v38  ;;  %v1185_v37 = vsel %vm1183_vm14, %v3477_v36, %v3478_v27  ;;  %v1299_v27 = vld [vmem:[%s5000_s4 + $0x50] sm:$0xff] }
 0x28f   : > { %v3486_v24 = vpop.permute.xlu1 %3485  ;;  %v3081_v48 = vpack.c.bf16 %v1187_v39, %v1185_v37  ;;  %v1291_v37 = vld [vmem:[%s5000_s4 + $0x10] sm:$0xff]  ;;  %v1294_v39 = vld [vmem:[%s5000_s4 + $0x28] sm:$0xff] }
 0x290   : > { %v3488_v12 = vunpack.i.h.bf16 %v3486_v24  ;;  %v3487_v47 = vunpack.i.l.bf16 %v3486_v24  ;;  %v1300_v24 = vld [vmem:[%s5000_s4 + $0x58] sm:$0xff] }
 0x291   : > { %3082 = vmatprep.subr.bf16.mxu0 %v3081_v48 }
 0x292   : > { %v1184_v49 = vsel %vm1183_vm14, %v3487_v47, %v3477_v36  ;;  %v1186_v50 = vsel %vm1183_vm14, %v3488_v12, %v3482_v29  ;;  %v1261_v29 = vsel %vm1256_vm15, %v3532_v20, %v3522_v15  ;;  %v1298_v36 = vld [vmem:[%s5000_s4 + $0x48] sm:$0xff]  ;;  %v1385_v12 = vpop.permute.xlu0 %1384 }
 0x293   : > { %v3496_v60 = vpop.permute.xlu1 %3495  ;;  %v3083_v18 = vpack.c.bf16 %v1186_v50, %v1184_v49  ;;  %v1685_v20 = vld [vmem:[%s5002_s6 + $0x8] sm:$0xff] }
 0x294   : > { %v3498_v51 = vunpack.i.h.bf16 %v3496_v60  ;;  %v3497_v59 = vunpack.i.l.bf16 %v3496_v60 }
 0x295   : > { %3084 = vmatpush1.bf16.msra.mxu0 %v3083_v18 }
 0x296   : > { %v1191_v57 = vsel %vm1183_vm14, %v3497_v59, %v3498_v51  ;;  %v1190_v17 = vsel %vm1183_vm14, %v3503_v46, %v3497_v59  ;;  %v1600_v49 = vpop.permute.xlu0 %1599 }
 0x297   : > { %v3506_v30 = vpop.permute.xlu1 %3505  ;;  %v3085_v0 = vpack.c.bf16 %v1191_v57, %v1189_v54  ;;  %v3087_v25 = vpack.c.bf16 %v1190_v17, %v1188_v55 }
 0x298   : > { %v3508_v1 = vunpack.i.h.bf16 %v3506_v30  ;;  %v3507_v13 = vunpack.i.l.bf16 %v3506_v30 }
 0x299   : > { %3086 = vmatprep.subr.bf16.mxu0 %v3085_v0 }
 0x29a   : > { %v1258_v3 = vsel %vm1256_vm15, %v3507_v13, %v3508_v1  ;;  %3088 = vmatpush1.bf16.msra.mxu0 %v3087_v25 }
 0x29b   : > { %v3089_v5 = vpack.c.bf16 %v1260_v35, %v1258_v3  ;;  %v3516_v6 = vpop.permute.xlu1 %3515 }
 0x29c   : > { %v3518_v8 = vunpack.i.h.bf16 %v3516_v6  ;;  %v3517_v9 = vunpack.i.l.bf16 %v3516_v6 }
 0x29d   : > { %1475 = vmatmul.mubr.f32.vlgmr.msra.gmra.mrb[0].mxu0 %v1289_v4  ;;  %3091 = vmatprep.subr.msk.bf16.mxu0 %vm4422_vm9, %v3089_v5 }
 0x29e   : > { %v1257_v16 = vsel %vm1256_vm15, %v3517_v9, %v3507_v13  ;;  %v1259_v44 = vsel %vm1256_vm15, %v3518_v8, %v3512_v62  ;;  %1480 = vmatprep.mubr.f32.mxu0 %v1293_v7  ;;  %v1395_v62 = vpop.permute.xlu0 %1394 }
 0x29f   : > { %v3092_v45 = vpack.c.bf16 %v1259_v44, %v1257_v16  ;;  %v3526_v21 = vpop.permute.xlu1 %3525  ;;  %v1684_v16 = vld [vmem:[%s5002_s6] sm:$0xff] }
 0x2a0   : > { %v3528_v53 = vunpack.i.h.bf16 %v3526_v21  ;;  %v3527_v23 = vunpack.i.l.bf16 %v3526_v21  ;;  %v1716_v44 = vld [vmem:[%s5003_s7] sm:$0xff]  ;;  %v1687_v21 = vld [vmem:[%s5002_s6 + $0x18] sm:$0xff] }
 0x2a1   : > { %1481 = vmatmul.mubr.f32.gmra.mrb[2].mxu0 %v1292_v26  ;;  %v1717_v26 = vld [vmem:[%s5003_s7 + $0x8] sm:$0xff] }
 0x2a2   : > { %v1263_v33 = vsel %vm1256_vm15, %v3533_v22, %v3527_v23  ;;  %v1264_v32 = vsel %vm1256_vm15, %v3527_v23, %v3528_v53  ;;  %3094 = vmatpush1.bf16.msk.msra.mxu0 %vm4426_vm10, %v3092_v45  ;;  %1486 = vmatprep.mubr.f32.mxu0 %v1296_v14  ;;  %v1610_v6 = vpop.permute.xlu0 %1609  ;;  %v1686_v45 = vld [vmem:[%s5002_s6 + $0x10] sm:$0xff] }
 0x2a3   : > { %v3095_v38 = vpack.c.bf16 %v1264_v32, %v1262_v28  ;;  %v3098_v31 = vpack.c.bf16 %v1263_v33, %v1261_v29 }
 0x2a5   : > { %1487 = vmatmul.mubr.f32.gmra.mrb[4].mxu0 %v1295_v34  ;;  %3097 = vmatprep.subr.msk.bf16.mxu0 %vm4422_vm9, %v3095_v38 }
 0x2a6   : > { %3100 = vmatpush1.bf16.msk.msra.mxu0 %vm4426_vm10, %v3098_v31  ;;  %1492 = vmatprep.mubr.f32.mxu0 %v1299_v27 }
 0x2a9   : > { %1493 = vmatmul.mubr.f32.gmra.mrb[6].mxu0 %v1298_v36 }
 0x2aa   : > { %1563 = vmatprep.mubr.f32.mxu0 %v3962_v41 }
 0x2ad   : > { %2885 = vmatmul.mubr.msk.f32.vlgmr.msra.gmra.mrb[0].mxu0 %vm1397_vm1, %v1291_v37 }
 0x2ae   : > { %1569 = vmatprep.mubr.f32.mxu0 %v3962_v41 }
 0x2b0   : > { %v1380_v48 = vpop.permute.xlu1 %1379 }
 0x2b1   : > { %2886 = vmatmul.mubr.msk.f32.gmra.mrb[2].mxu0 %vm1397_vm1, %v1294_v39 }
 0x2b2   : > { %1575 = vmatprep.mubr.f32.mxu0 %v3962_v41 }
 0x2b4   : > { %v1595_v47 = vpop.permute.xlu1 %1594 }
 0x2b5   : > { %2887 = vmatmul.mubr.msk.f32.gmra.mrb[4].mxu0 %vm1397_vm1, %v1297_v42 }
 0x2b6   : > { %1581 = vmatprep.mubr.f32.mxu0 %v3962_v41 }
 0x2b8   : > { %v1390_v18 = vpop.permute.xlu1 %1389 }
 0x2b9   : > { %2888 = vmatmul.mubr.msk.f32.gmra.mrb[6].mxu0 %vm1397_vm1, %v1300_v24 }
 0x2bc   : > { %v1605_v25 = vpop.permute.xlu1 %1604 }
 0x380   : > { %v1565_v52 = vpop.f32.mrb[0].mxu0 }
 0x381   : > { %v3197_v58 = vadd.f32 %v1565_v52, %v1380_v48  ;;  %v1567_v40 = vpop.f32.mrb[1].mxu0 }
 0x382   : > { %v3198_v50 = vadd.f32 %v1567_v40, %v1380_v48 }
 0x383   : > { %v1612_v60 = vadd.f32 %v3197_v58, %v1595_v47 }
 0x384   : > { %v1613_v46 = vadd.f32 %v3198_v50, %v1595_v47  ;;  %v1571_v51 = vpop.f32.mrb[2].mxu0 }
 0x385   : > { %v3199_v59 = vadd.f32 %v1571_v51, %v1385_v12  ;;  %v1573_v11 = vpop.f32.mrb[3].mxu0  ;;  %v1718_v51 = vld [vmem:[%s5003_s7 + $0x10] sm:$0xff] }
 0x386   : > { %v3200_v54 = vadd.f32 %v1573_v11, %v1385_v12  ;;  %v1620_v55 = vadd.f32 %v1613_v46, %v1612_v60 }
 0x387   : > { %v1614_v61 = vadd.f32 %v3199_v59, %v1600_v49  ;;  %v1719_v59 = vld [vmem:[%s5003_s7 + $0x18] sm:$0xff] }
 0x388   : > { %v1615_v57 = vadd.f32 %v3200_v54, %v1600_v49  ;;  %v1577_v17 = vpop.f32.mrb[4].mxu0  ;;  %1621 = vadd.xlane.f32.xlu1 %v1620_v55 }
 0x389   : > { %v3201_v30 = vadd.f32 %v1577_v17, %v1390_v18  ;;  %v1579_v0 = vpop.f32.mrb[5].mxu0 }
 0x38a   : > { %v3202_v1 = vadd.f32 %v1579_v0, %v1390_v18  ;;  %v1623_v13 = vadd.f32 %v1615_v57, %v1614_v61 }
 0x38b   : > { %v1616_v35 = vadd.f32 %v3201_v30, %v1605_v25 }
 0x38c   : > { %v1617_v3 = vadd.f32 %v3202_v1, %v1605_v25  ;;  %v1583_v4 = vpop.f32.mrb[6].mxu0  ;;  %1624 = vadd.xlane.f32.xlu0 %v1623_v13 }
 0x38d   : > { %v3203_v63 = vadd.f32 %v1583_v4, %v1395_v62  ;;  %v1585_v5 = vpop.f32.mrb[7].mxu0 }
 0x38e   : > { %v3204_v7 = vadd.f32 %v1585_v5, %v1395_v62  ;;  %v1626_v8 = vadd.f32 %v1617_v3, %v1616_v35 }
 0x38f   : > { %v1618_v9 = vadd.f32 %v3203_v63, %v1610_v6 }
 0x390   : > { %v1619_v10 = vadd.f32 %v3204_v7, %v1610_v6  ;;  %1627 = vadd.xlane.f32.xlu0 %v1626_v8 }
 0x392   : > { %v1629_v15 = vadd.f32 %v1619_v10, %v1618_v9 }
 0x394   : > { %1630 = vadd.xlane.f32.xlu1 %v1629_v15 }
 0x3a5   : > { %1695 = vperm.xlu1 %3293, %v1685_v20  }
 0x3a6   : > { %1690 = vperm.xlu0 %3292, %v1684_v16  }
 0x3a9   : > { %1722 = vperm.xlu1 %3293, %v1716_v44  }
 0x3aa   : > { %1727 = vperm.xlu0 %3292, %v1717_v26  }
 0x3ad   : > { %1700 = vperm.xlu1 %3293, %v1686_v45  }
 0x3ae   : > { %1705 = vperm.xlu0 %3292, %v1687_v21  }
 0x415   : > { %v1622_v14 = vpop.xlane.xlu1 %1621 }
 0x416   : > { %v1632_v22 = vmul.f32 0.00390625, %v1622_v14 }
 0x418   : > { %v1636_v53 = vsub.f32 %v1612_v60, %v1632_v22  ;;  %v1637_v23 = vsub.f32 %v1613_v46, %v1632_v22 }
 0x419   : > { %v1625_v28 = vpop.xlane.xlu0 %1624 }
 0x41a   : > { %v1633_v29 = vmul.f32 0.00390625, %v1625_v28  ;;  %v1644_v33 = vmul.f32 %v1636_v53, %v1636_v53  ;;  %v1645_v32 = vmul.f32 %v1637_v23, %v1637_v23 }
 0x41c   : > { %v4614_v34 = vsub.f32 %v1614_v61, %v1633_v29  ;;  %v4616_v38 = vsub.f32 %v1615_v57, %v1633_v29  ;;  %v1652_v31 = vadd.f32 %v1645_v32, %v1644_v33 }
 0x41d   : > { %v1628_v27 = vpop.xlane.xlu0 %1627 }
 0x41e   : > { %v1634_v36 = vmul.f32 0.00390625, %v1628_v27  ;;  %1653 = vadd.xlane.f32.xlu0 %v1652_v31  ;;  %v1646_v37 = vmul.f32 %v4614_v34, %v4614_v34  ;;  %v1647_v39 = vmul.f32 %v4616_v38, %v4616_v38 }
 0x420   : > { %v4622_v42 = vsub.f32 %v1616_v35, %v1634_v36  ;;  %v4624_v24 = vsub.f32 %v1617_v3, %v1634_v36  ;;  %v1655_v48 = vadd.f32 %v1647_v39, %v1646_v37 }
 0x421   : > { %v1631_v12 = vpop.xlane.xlu1 %1630 }
 0x422   : > { %v1635_v47 = vmul.f32 0.00390625, %v1631_v12  ;;  %1656 = vadd.xlane.f32.xlu1 %v1655_v48  ;;  %v1648_v52 = vmul.f32 %v4622_v42, %v4622_v42  ;;  %v1649_v58 = vmul.f32 %v4624_v24, %v4624_v24 }
 0x424   : > { %v4630_v40 = vsub.f32 %v1618_v9, %v1635_v47  ;;  %v4632_v49 = vsub.f32 %v1619_v10, %v1635_v47  ;;  %v1658_v50 = vadd.f32 %v1649_v58, %v1648_v52 }
 0x425   : > { %v1691_v11 = vpop.permute.xlu0 %1690  ;;  %v1696_v54 = vpop.permute.xlu1 %1695 }
 0x426   : > { %1659 = vadd.xlane.f32.xlu0 %v1658_v50  ;;  %v1650_v60 = vmul.f32 %v4630_v40, %v4630_v40  ;;  %v1651_v18 = vmul.f32 %v4632_v49, %v4632_v49 }
 0x428   : > { %v1661_v46 = vadd.f32 %v1651_v18, %v1650_v60 }
 0x429   : > { %v1728_v55 = vpop.permute.xlu0 %1727  ;;  %v1723_v61 = vpop.permute.xlu1 %1722 }
 0x42a   : > { %1662 = vadd.xlane.f32.xlu1 %v1661_v46 }
 0x42d   : > { %v1706_v62 = vpop.permute.xlu0 %1705  ;;  %v1701_v57 = vpop.permute.xlu1 %1700 }
 0x43b   : > { %1732 = vperm.xlu1 %3293, %v1718_v51  }
 0x43c   : > { %1737 = vperm.xlu0 %3292, %v1719_v59  }
 0x43f   : > { %3535 = vrot.lane.b32.xlu1 %v3962_v41, %s5041_s21 }
 0x440   : > { %3540 = vrot.lane.b32.xlu0 %v3962_v41, %s5041_s21 }
 0x443   : > { %3545 = vrot.lane.b32.xlu1 %v3962_v41, %s5042_s11 }
 0x444   : > { %3550 = vrot.lane.b32.xlu0 %v3962_v41, %s5042_s11 }
 0x447   : > { %3555 = vrot.lane.b32.xlu1 %v3962_v41, %s5043_s18 }
 0x4ab   : > { %v1654_v17 = vpop.xlane.xlu0 %1653 }
 0x4ac   : > { %v1664_v30 = vmul.f32 0.00390625, %v1654_v17 }
 0x4ae   : > { %v1668_v0 = vadd.f32 1e-05, %v1664_v30 }
 0x4af   : > { %v1657_v25 = vpop.xlane.xlu1 %1656 }
 0x4b0   : > { %3814 = vrsqrt.f32 %v1668_v0  ;;  %v1665_v1 = vmul.f32 0.00390625, %v1657_v25 }
 0x4b2   : > { %v1669_v13 = vadd.f32 1e-05, %v1665_v1 }
 0x4b3   : > { %v1660_v35 = vpop.xlane.xlu0 %1659 }
 0x4b4   : > { %3816 = vrsqrt.f32 %v1669_v13  ;;  %v1666_v3 = vmul.f32 0.00390625, %v1660_v35 }
 0x4b6   : > { %v1670_v4 = vadd.f32 1e-05, %v1666_v3 }
 0x4b7   : > { %v1663_v63 = vpop.xlane.xlu1 %1662 }
 0x4b8   : > { %3818 = vrsqrt.f32 %v1670_v4  ;;  %v1667_v5 = vmul.f32 0.00390625, %v1663_v63 }
 0x4ba   : > { %v3815_v6 = vpop.eup %3814  ;;  %v1671_v7 = vadd.f32 1e-05, %v1667_v5 }
 0x4bb   : > { %v1676_v8 = vmul.f32 %v3815_v6, %v1636_v53  ;;  %v1677_v9 = vmul.f32 %v3815_v6, %v1637_v23  ;;  %v1733_v39 = vpop.permute.xlu1 %1732  ;;  %v1738_v50 = vpop.permute.xlu0 %1737 }
 0x4bc   : > { %3820 = vrsqrt.f32 %v1671_v7 }
 0x4bd   : > { %v1708_v10 = vmul.f32 %v1691_v11, %v1676_v8  ;;  %v1709_v15 = vmul.f32 %v1691_v11, %v1677_v9 }
 0x4be   : > { %v3817_v20 = vpop.eup %3816 }
 0x4bf   : > { %v1740_v16 = vadd.f32 %v1723_v61, %v1708_v10  ;;  %v1741_v44 = vadd.f32 %v1723_v61, %v1709_v15  ;;  %v1678_v26 = vmul.f32 %v3817_v20, %v4614_v34  ;;  %v1679_v45 = vmul.f32 %v3817_v20, %v4616_v38 }
 0x4c1   : > { %v2889_v21 = vmul.f32 -1.442695, %v1740_v16  ;;  %v2890_v14 = vmul.f32 -1.442695, %v1741_v44  ;;  %v1710_v22 = vmul.f32 %v1696_v54, %v1678_v26  ;;  %v1711_v28 = vmul.f32 %v1696_v54, %v1679_v45 }
 0x4c2   : > { %v3819_v29 = vpop.eup %3818 }
 0x4c3   : > { %3822 = vpow2.f32 %v2889_v21  ;;  %v1742_v33 = vadd.f32 %v1728_v55, %v1710_v22  ;;  %v1743_v32 = vadd.f32 %v1728_v55, %v1711_v28  ;;  %v1680_v53 = vmul.f32 %v3819_v29, %v4622_v42 }
 0x4c4   : > { %3824 = vpow2.f32 %v2890_v14  ;;  %v1681_v23 = vmul.f32 %v3819_v29, %v4624_v24 }
 0x4c5   : > { %v2891_v31 = vmul.f32 -1.442695, %v1742_v33  ;;  %v2892_v27 = vmul.f32 -1.442695, %v1743_v32  ;;  %v1712_v36 = vmul.f32 %v1701_v57, %v1680_v53 }
 0x4c6   : > { %v3821_v37 = vpop.eup %3820  ;;  %v1713_v34 = vmul.f32 %v1701_v57, %v1681_v23 }
 0x4c7   : > { %3826 = vpow2.f32 %v2891_v31  ;;  %v1682_v38 = vmul.f32 %v3821_v37, %v4630_v40  ;;  %v1683_v48 = vmul.f32 %v3821_v37, %v4632_v49  ;;  %v1744_v12 = vadd.f32 %v1733_v39, %v1712_v36 }
 0x4c8   : > { %3828 = vpow2.f32 %v2892_v27  ;;  %v4660_v47 = vadd.f32 %v1733_v39, %v1713_v34 }
 0x4c9   : > { %v1714_v52 = vmul.f32 %v1706_v62, %v1682_v38  ;;  %v1715_v42 = vmul.f32 %v1706_v62, %v1683_v48  ;;  %v2893_v58 = vmul.f32 -1.442695, %v1744_v12  ;;  %v2453_v38 = vld [vmem:[#allocation4 + $0x8] sm:$0xff]  ;;  %v2536_v48 = vld [vmem:[%s5005_s9] sm:$0xff] }
 0x4ca   : > { %v2894_v24 = vmul.f32 -1.442695, %v4660_v47  ;;  %2636 = vmatprep.mubr.f32.mxu1 %v2453_v38 }
 0x4cb   : > { %v1746_v60 = vadd.f32 %v1738_v50, %v1714_v52  ;;  %v1747_v18 = vadd.f32 %v1738_v50, %v1715_v42  ;;  %3830 = vpow2.f32 %v2893_v58  ;;  %v2539_v52 = vld [vmem:[%s5005_s9 + $0x18] sm:$0xff]  ;;  %v3536_v42 = vpop.permute.xlu1 %3535  ;;  %v3541_v50 = vpop.permute.xlu0 %3540 }
 0x4cc   : > { %3832 = vpow2.f32 %v2894_v24 }
 0x4cd   : > { %v3823_v46 = vpop.eup %3822  ;;  %v2895_v51 = vmul.f32 -1.442695, %v1746_v60  ;;  %v2896_v11 = vmul.f32 -1.442695, %v1747_v18 }
 0x4ce   : > { %v3825_v59 = vpop.eup %3824  ;;  %v1772_v40 = vadd.f32 1.0, %v3823_v46 }
 0x4cf   : > { %v1773_v49 = vadd.f32 1.0, %v3825_v59  ;;  %3834 = vpow2.f32 %v2895_v51  ;;  %v4766_v58 = vpop.permute.xlu1 %3545 }
 0x4d0   : > { %3836 = vrcp.f32 %v1772_v40 }
 0x4d1   : > { %v3827_v54 = vpop.eup %3826  ;;  %3838 = vrcp.f32 %v1773_v49  ;;  %v3537_v49 = vunpack.i.l.bf16 %v3536_v42 }
 0x4d2   : > { %v3829_v55 = vpop.eup %3828  ;;  %v1774_v61 = vadd.f32 1.0, %v3827_v54  ;;  %3840 = vpow2.f32 %v2896_v11  ;;  %v3538_v11 = vunpack.i.h.bf16 %v3536_v42 }
 0x4d3   : > { %v1775_v62 = vadd.f32 1.0, %v3829_v55  ;;  %v4768_v24 = vpop.permute.xlu1 %3555 }
 0x4d4   : > { %3842 = vrcp.f32 %v1774_v61 }
 0x4d5   : > { %v3831_v57 = vpop.eup %3830  ;;  %3844 = vrcp.f32 %v1775_v62 }
 0x4d6   : > { %v3833_v17 = vpop.eup %3832  ;;  %v1776_v30 = vadd.f32 1.0, %v3831_v57 }
 0x4d7   : > { %v1777_v25 = vadd.f32 1.0, %v3833_v17 }
 0x4d8   : > { %3846 = vrcp.f32 %v1776_v30 }
 0x4d9   : > { %v3835_v0 = vpop.eup %3834 }
 0x4da   : > { %v3837_v1 = vpop.eup %3836  ;;  %v1778_v13 = vadd.f32 1.0, %v3835_v0 }
 0x4db   : > { %v3839_v35 = vpop.eup %3838  ;;  %v4663_v3 = vmul.f32 %v3837_v1, %v1740_v16 }
 0x4dc   : > { %v3841_v4 = vpop.eup %3840  ;;  %v4665_v63 = vmul.f32 %v3839_v35, %v1741_v44  ;;  %3848 = vrcp.f32 %v1778_v13 }
 0x4dd   : > { %v1779_v5 = vadd.f32 1.0, %v3841_v4  ;;  %3850 = vrcp.f32 %v1777_v25 }
 0x4de   : > { %v3843_v6 = vpop.eup %3842  ;;  %v3559_v7 = vpack.i.bf16 %v4665_v63, %v4663_v3  ;;  %v3649_v36 = vpack.i.bf16 %v3962_v41, %v4665_v63 }
 0x4df   : > { %v3845_v8 = vpop.eup %3844  ;;  %v4669_v9 = vmul.f32 %v3843_v6, %v1742_v33  ;;  %3852 = vrcp.f32 %v1779_v5 }
 0x4e0   : > { %v4671_v10 = vmul.f32 %v3845_v8, %v1743_v32  ;;  %3560 = vrot.lane.b32.xlu1 %v3559_v7, %s5041_s21  ;;  %v3543_v8 = vunpack.i.h.bf16 %v3541_v50 }
 0x4e1   : > { %v3754_v15 = vpack.i.bf16 %v4669_v9, %v4663_v3  ;;  %v3147_v26 = vpack.c.bf16 %v4669_v9, %v4663_v3 }
 0x4e2   : > { %v3574_v20 = vpack.i.bf16 %v4671_v10, %v4669_v9  ;;  %v3847_v16 = vpop.eup %3846  ;;  %v3145_v44 = vpack.c.bf16 %v4671_v10, %v4665_v63  ;;  %v3654_v37 = vpack.i.bf16 %v3962_v41, %v4671_v10 }
 0x4e3   : > { %v4686_v22 = vmul.f32 %v3847_v16, %v1744_v12  ;;  %v2538_v12 = vld [vmem:[%s5005_s9 + $0x10] sm:$0xff] }
 0x4e4   : > { %3565 = vrot.lane.b32.xlu1 %v3559_v7, %s5042_s11  ;;  %3575 = vrot.lane.b32.xlu0 %v3574_v20, %s5041_s21 }
 0x4e6   : > { %v3849_v45 = vpop.eup %3848 }
 0x4e7   : > { %v3851_v21 = vpop.eup %3850  ;;  %v4684_v14 = vmul.f32 %v3849_v45, %v1746_v60  ;;  %v4770_v60 = vpop.permute.xlu0 %3550 }
 0x4e8   : > { %3570 = vrot.lane.b32.xlu1 %v3559_v7, %s5043_s18  ;;  %3580 = vrot.lane.b32.xlu0 %v3574_v20, %s5042_s11  ;;  %v4695_v32 = vmul.f32 %v3851_v21, %v4660_v47  ;;  %v2537_v47 = vld [vmem:[%s5005_s9 + $0x8] sm:$0xff] }
 0x4e9   : > { %v3853_v28 = vpop.eup %3852  ;;  %v3769_v29 = vpack.i.bf16 %v4684_v14, %v4686_v22  ;;  %v3151_v53 = vpack.c.bf16 %v4684_v14, %v4686_v22 }
 0x4ea   : > { %v4692_v33 = vmul.f32 %v3853_v28, %v1747_v18  ;;  %v3589_v31 = vpack.i.bf16 %v4695_v32, %v4686_v22  ;;  %v3669_v34 = vpack.i.bf16 %v3962_v41, %v4695_v32 }
 0x4ec   : > { %3585 = vrot.lane.b32.xlu0 %v3574_v20, %s5043_s18  ;;  %v3609_v23 = vpack.i.bf16 %v4692_v33, %v4684_v14  ;;  %v3149_v27 = vpack.c.bf16 %v4692_v33, %v4695_v32  ;;  %v3694_v39 = vpack.i.bf16 %v3962_v41, %v4692_v33 }
 0x4ee   : > { %3610 = vrot.lane.b32.xlu1 %v3609_v23, %s5041_s21 }
 0x4f0   : > { %3590 = vrot.lane.b32.xlu0 %v3589_v31, %s5041_s21 }
 0x4f2   : > { %3615 = vrot.lane.b32.xlu1 %v3559_v7, %s5044_s12 }
 0x4f4   : > { %3595 = vrot.lane.b32.xlu0 %v3962_v41, %s5043_s18 }
 0x4f6   : > { %3625 = vrot.lane.b32.xlu1 %v3609_v23, %s5042_s11 }
 0x4f8   : > { %3600 = vrot.lane.b32.xlu0 %v3589_v31, %s5042_s11 }
 0x4fa   : > { %3630 = vrot.lane.b32.xlu1 %v3962_v41, %s5044_s12 }
 0x4fc   : > { %3605 = vrot.lane.b32.xlu0 %v3589_v31, %s5043_s18 }
 0x4fe   : > { %3645 = vrot.lane.b32.xlu1 %v3609_v23, %s5043_s18  ;;  %s4948_s18 = scalar_lea.hbm %s5006_s10, %s2908_s30 }
 0x500   : > { %3620 = vrot.lane.b32.xlu0 %v3574_v20, %s5044_s12 }
 0x502   : > { %3650 = vrot.lane.b32.xlu1 %v3649_v36, %s3967_s25 }
 0x504   : > { %3635 = vrot.lane.b32.xlu0 %v3589_v31, %s5044_s12 }
 0x506   : > { %3660 = vrot.lane.b32.xlu1 %v3609_v23, %s5044_s12 }
 0x508   : > { %3640 = vrot.lane.b32.xlu0 %v3962_v41, %s5044_s12 }
 0x50a   : > { %3665 = vrot.lane.b32.xlu1 %v3754_v15, %s3967_s25 }
 0x50c   : > { %3655 = vrot.lane.b32.xlu0 %v3654_v37, %s3967_s25 }
 0x50e   : > { %3675 = vrot.lane.b32.xlu1 %v3649_v36, %s5045_s0 }
 0x510   : > { %3670 = vrot.lane.b32.xlu0 %v3669_v34, %s3967_s25 }
 0x512   : > { %3685 = vrot.lane.b32.xlu1 %v3754_v15, %s5045_s0 }
 0x514   : > { %3680 = vrot.lane.b32.xlu0 %v3654_v37, %s5045_s0 }
 0x516   : > { %3695 = vrot.lane.b32.xlu1 %v3694_v39, %s3967_s25 }
 0x518   : > { %3690 = vrot.lane.b32.xlu0 %v3669_v34, %s5045_s0 }
 0x51a   : > { %3700 = vrot.lane.b32.xlu1 %v3649_v36, %s5046_s28 }
 0x51c   : > { %3705 = vrot.lane.b32.xlu0 %v3769_v29, %s3967_s25 }
 0x51e   : > { %3715 = vrot.lane.b32.xlu1 %v3694_v39, %s5045_s0 }
 0x520   : > { %3710 = vrot.lane.b32.xlu0 %v3654_v37, %s5046_s28 }
 0x522   : > { %3720 = vrot.lane.b32.xlu1 %v3754_v15, %s5046_s28 }
 0x524   : > { %3725 = vrot.lane.b32.xlu0 %v3769_v29, %s5045_s0  ;;  %s3971_s0 = smov [#allocation7]  }
 0x526   : > { %3735 = vrot.lane.b32.xlu1 %v3694_v39, %s5046_s28 }
 0x528   : > { %3730 = vrot.lane.b32.xlu0 %v3669_v34, %s5046_s28 }
 0x52a   : > { %3745 = vrot.lane.b32.xlu1 %v3649_v36, %s5047_s26 }
 0x52c   : > { %3740 = vrot.lane.b32.xlu0 %v3769_v29, %s5046_s28  ;;  %s380_s28 = sand.u32 1, %s3948_s14  }
 0x52d   : > { %s4954_s17 = scalar_lea.sflag [#allocation6], %s380_s28 }
 0x52e   : > { %3755 = vrot.lane.b32.xlu1 %v3754_v15, %s5047_s26  ;;  %v3542_v15 = vunpack.i.l.bf16 %v3541_v50 }
 0x530   : > { %3750 = vrot.lane.b32.xlu0 %v3654_v37, %s5047_s26 }
 0x532   : > { %3765 = vrot.lane.b32.xlu1 %v3694_v39, %s5047_s26  ;;  %v3548_v39 = vunpack.i.h.bf16 %v4766_v58 }
 0x534   : > { %3760 = vrot.lane.b32.xlu0 %v3669_v34, %s5047_s26 }
 0x536   : > { %2542 = vperm.xlu1 %3293, %v2536_v48  }
 0x538   : > { %3770 = vrot.lane.b32.xlu0 %v3769_v29, %s5047_s26  ;;  %s2872_s26 = sshll.u32 %s380_s28, 6 }
 0x539   : > { %s4927_s25 = scalar_lea.vmem [#allocation7], %s2872_s26  ;;  %s3894_s26 = sshll.u32 %s3971_s0, 4  ;;  %s3895_s26 = int_to_ptr.vmem [resolvable:$false] %s3894_s26 }
 0x53a   : > { %2552 = vperm.xlu1 %3293, %v2538_v12   ;;  %s2780_s29 = sshll.u32 %s4927_s25, 4  ;;  %s4941_s29 = int_to_ptr.vmem [resolvable:$true] %s2780_s29 }
 0x53b   : > { %s3890_s12 = scalar_lea.vmem %s4941_s29, 1024  ;;  %p3897_p2 = scmp.lt.s32.totalorder %s4941_s29, %s3895_s26 }
 0x53c   : > { %2547 = vperm.xlu0 %3292, %v2537_v47   ;;  %v3547_v47 = vunpack.i.l.bf16 %v4766_v58  ;;  %v3552_v58 = vunpack.i.l.bf16 %v4770_v60  ;;  %p3891_p6 = scmp.ne.s32.totalorder %s4941_s29, %s3890_s12 }
 0x53e   : > { %p3892_p10 = pnand %p3891_p6, %p5048_p9 }
 0x540   : > { %2557 = vperm.xlu0 %3292, %v2539_v52   ;;  %p3893_p12 = pneg %p3892_p10 }
 0x552   : > { %v3561_v18 = vpop.permute.xlu1 %3560 }
 0x553   : > { %v3563_v46 = vunpack.i.h.bf16 %v3561_v18  ;;  %v3562_v51 = vunpack.i.l.bf16 %v3561_v18 }
 0x555   : > { %v1861_v61 = vsel %vm685_vm0, %v3562_v51, %v3563_v46  ;;  %v1860_v57 = vsel %vm685_vm0, %v3537_v49, %v3562_v51 }
 0x556   : > { %v3576_v59 = vpop.permute.xlu0 %3575  ;;  %v3566_v40 = vpop.permute.xlu1 %3565 }
 0x557   : > { %v3578_v54 = vunpack.i.h.bf16 %v3576_v59  ;;  %v3577_v55 = vunpack.i.l.bf16 %v3576_v59  ;;  %v3568_v16 = vunpack.i.h.bf16 %v3566_v40  ;;  %v3567_v45 = vunpack.i.l.bf16 %v3566_v40 }
 0x559   : > { %v1863_v62 = vsel %vm685_vm0, %v3577_v55, %v3578_v54  ;;  %v1862_v17 = vsel %vm685_vm0, %v3538_v11, %v3577_v55  ;;  %v1941_v52 = vsel %vm766_vm5, %v3567_v45, %v3568_v16  ;;  %v3553_v11 = vunpack.i.h.bf16 %v4770_v60 }
 0x55a   : > { %v3581_v30 = vpop.permute.xlu0 %3580  ;;  %v4776_v0 = vpop.permute.xlu1 %3570  ;;  %v3101_v25 = vpack.c.bf16 %v1863_v62, %v1861_v61  ;;  %v3104_v1 = vpack.c.bf16 %v1862_v17, %v1860_v57  ;;  %v1940_v55 = vsel %vm766_vm5, %v3547_v47, %v3567_v45 }
 0x55b   : > { %v3583_v35 = vunpack.i.h.bf16 %v3581_v30  ;;  %v3582_v4 = vunpack.i.l.bf16 %v3581_v30  ;;  %v3573_v49 = vunpack.i.h.bf16 %v4776_v0  ;;  %v3572_v61 = vunpack.i.l.bf16 %v4776_v0 }
 0x55c   : > { %3103 = vmatprep.subr.msk.bf16.mxu1 %vm4333_vm3, %v3101_v25  ;;  %v3558_v30 = vunpack.i.h.bf16 %v4768_v24 }
 0x55d   : > { %3106 = vmatpush1.bf16.msk.msra.mxu1 %vm4342_vm4, %v3104_v1  ;;  %v1943_v23 = vsel %vm766_vm5, %v3582_v4, %v3583_v35  ;;  %v1942_v51 = vsel %vm766_vm5, %v3548_v39, %v3582_v4 }
 0x55e   : > { %v3586_v13 = vpop.permute.xlu0 %3585  ;;  %v3113_v46 = vpack.c.bf16 %v1943_v23, %v1941_v52  ;;  %v3115_v17 = vpack.c.bf16 %v1942_v51, %v1940_v55 }
 0x55f   : > { %v3588_v42 = vunpack.i.h.bf16 %v3586_v13  ;;  %v3587_v50 = vunpack.i.l.bf16 %v3586_v13 }
 0x560   : > { %v3611_v5 = vpop.permute.xlu1 %3610 }
 0x561   : > { %v3613_v6 = vunpack.i.h.bf16 %v3611_v5  ;;  %v3612_v7 = vunpack.i.l.bf16 %v3611_v5  ;;  %v2015_v25 = vsel %vm843_vm6, %v3587_v50, %v3588_v42  ;;  %v3557_v5 = vunpack.i.l.bf16 %v4768_v24 }
 0x562   : > { %v3591_v20 = vpop.permute.xlu0 %3590 }
 0x563   : > { %v3593_v21 = vunpack.i.h.bf16 %v3591_v20  ;;  %v3592_v28 = vunpack.i.l.bf16 %v3591_v20  ;;  %v1866_v31 = vsel %vm685_vm0, %v3543_v8, %v3612_v7  ;;  %v1867_v36 = vsel %vm685_vm0, %v3612_v7, %v3613_v6 }
 0x564   : > { %v4782_v29 = vpop.permute.xlu1 %3615  ;;  %v2013_v8 = vsel %vm843_vm6, %v3572_v61, %v3573_v49 }
 0x565   : > { %v1864_v37 = vsel %vm685_vm0, %v3542_v15, %v3592_v28  ;;  %v1865_v34 = vsel %vm685_vm0, %v3592_v28, %v3593_v21  ;;  %v2014_v15 = vsel %vm843_vm6, %v3558_v30, %v3587_v50  ;;  %v3121_v45 = vpack.c.bf16 %v2015_v25, %v2013_v8 }
 0x566   : > { %v3107_v38 = vpack.c.bf16 %v1867_v36, %v1865_v34  ;;  %v3110_v48 = vpack.c.bf16 %v1866_v31, %v1864_v37  ;;  %v3596_v12 = vpop.permute.xlu0 %3595  ;;  %v2012_v28 = vsel %vm843_vm6, %v3557_v5, %v3572_v61  ;;  %v3618_v37 = vunpack.i.h.bf16 %v4782_v29 }
 0x567   : > { %v3124_v24 = vpack.c.bf16 %v2014_v15, %v2012_v28  ;;  %v3598_v34 = vunpack.i.h.bf16 %v3596_v12  ;;  %v3597_v39 = vunpack.i.l.bf16 %v3596_v12 }
 0x568   : > { %v3626_v18 = vpop.permute.xlu1 %3625  ;;  %3109 = vmatprep.subr.msk.bf16.mxu1 %vm4333_vm3, %v3107_v38 }
 0x569   : > { %v3628_v59 = vunpack.i.h.bf16 %v3626_v18  ;;  %v3627_v40 = vunpack.i.l.bf16 %v3626_v18  ;;  %3112 = vmatpush1.bf16.msk.msra.mxu1 %vm4342_vm4, %v3110_v48  ;;  %v3617_v48 = vunpack.i.l.bf16 %v4782_v29 }
 0x56a   : > { %v3601_v54 = vpop.permute.xlu0 %3600  ;;  %3114 = vmatprep.subr.bf16.mxu1 %v3113_v46 }
 0x56b   : > { %v3603_v62 = vunpack.i.h.bf16 %v3601_v54  ;;  %v3602_v57 = vunpack.i.l.bf16 %v3601_v54  ;;  %v1947_v60 = vsel %vm766_vm5, %v3627_v40, %v3628_v59  ;;  %v1946_v4 = vsel %vm766_vm5, %v3553_v11, %v3627_v40 }
 0x56c   : > { %v3631_v1 = vpop.permute.xlu1 %3630  ;;  %v2093_v29 = vsel %vm924_vm11, %v3617_v48, %v3618_v37 }
 0x56d   : > { %3116 = vmatpush1.bf16.msra.mxu1 %v3115_v17  ;;  %v1945_v13 = vsel %vm766_vm5, %v3602_v57, %v3603_v62  ;;  %v1944_v35 = vsel %vm766_vm5, %v3552_v58, %v3602_v57  ;;  %v3633_v50 = vunpack.i.h.bf16 %v3631_v1  ;;  %v3632_v12 = vunpack.i.l.bf16 %v3631_v1 }
 0x56e   : > { %v3606_v0 = vpop.permute.xlu0 %3605  ;;  %v3117_v6 = vpack.c.bf16 %v1947_v60, %v1945_v13  ;;  %v3119_v7 = vpack.c.bf16 %v1946_v4, %v1944_v35 }
 0x56f   : > { %v3608_v20 = vunpack.i.h.bf16 %v3606_v0  ;;  %v3607_v16 = vunpack.i.l.bf16 %v3606_v0  ;;  %v2092_v25 = vsel %vm924_vm11, %v3632_v12, %v3617_v48 }
 0x570   : > { %v3646_v21 = vpop.permute.xlu1 %3645  ;;  %3118 = vmatprep.subr.bf16.mxu1 %v3117_v6 }
 0x571   : > { %v2017_v23 = vsel %vm843_vm6, %v3607_v16, %v3608_v20  ;;  %v3648_v31 = vunpack.i.h.bf16 %v3646_v21  ;;  %v3647_v36 = vunpack.i.l.bf16 %v3646_v21  ;;  %3120 = vmatpush1.bf16.msra.mxu1 %v3119_v7  ;;  %v2016_v18 = vsel %vm843_vm6, %v3597_v39, %v3607_v16 }
 0x572   : > { %v3621_v38 = vpop.permute.xlu0 %3620  ;;  %3123 = vmatprep.subr.msk.bf16.mxu1 %vm4422_vm9, %v3121_v45 }
 0x573   : > { %v2019_v47 = vsel %vm843_vm6, %v3647_v36, %v3648_v31  ;;  %v3623_v52 = vunpack.i.h.bf16 %v3621_v38  ;;  %v3622_v42 = vunpack.i.l.bf16 %v3621_v38  ;;  %v2018_v46 = vsel %vm843_vm6, %v3598_v34, %v3647_v36 }
 0x574   : > { %v3127_v51 = vpack.c.bf16 %v2019_v47, %v2017_v23  ;;  %v3651_v59 = vpop.permute.xlu1 %3650  ;;  %v3130_v58 = vpack.c.bf16 %v2018_v46, %v2016_v18 }
 0x575   : > { %v2095_v40 = vsel %vm924_vm11, %v3622_v42, %v3623_v52  ;;  %3126 = vmatpush1.bf16.msk.msra.mxu1 %vm4426_vm10, %v3124_v24  ;;  %v2094_v55 = vsel %vm924_vm11, %v3633_v50, %v3622_v42  ;;  %v3653_v28 = vunpack.i.h.bf16 %v3651_v59  ;;  %v3652_v23 = vunpack.i.l.bf16 %v3651_v59 }
 0x576   : > { %v3636_v11 = vpop.permute.xlu0 %3635  ;;  %3129 = vmatprep.subr.msk.bf16.mxu1 %vm4422_vm9, %v3127_v51  ;;  %v3133_v61 = vpack.c.bf16 %v2095_v40, %v2093_v29  ;;  %v3136_v13 = vpack.c.bf16 %v2094_v55, %v2092_v25 }
 0x577   : > { %v3638_v49 = vunpack.i.h.bf16 %v3636_v11  ;;  %v3637_v54 = vunpack.i.l.bf16 %v3636_v11  ;;  %v2189_v39 = vsel %vm1021_vm12, %v3652_v23, %v3653_v28 }
 0x578   : > { %v3661_v62 = vpop.permute.xlu1 %3660 }
 0x579   : > { %v2097_v57 = vsel %vm924_vm11, %v3637_v54, %v3638_v49  ;;  %v3663_v17 = vunpack.i.h.bf16 %v3661_v62  ;;  %v3662_v30 = vunpack.i.l.bf16 %v3661_v62  ;;  %3132 = vmatpush1.bf16.msk.msra.mxu1 %vm4426_vm10, %v3130_v58 }
 0x57a   : > { %v3641_v1 = vpop.permute.xlu0 %3640  ;;  %3135 = vmatprep.subr.msk.bf16.mxu1 %vm4333_vm3, %v3133_v61 }
 0x57b   : > { %v2099_v60 = vsel %vm924_vm11, %v3662_v30, %v3663_v17  ;;  %v3643_v35 = vunpack.i.h.bf16 %v3641_v1  ;;  %v3642_v4 = vunpack.i.l.bf16 %v3641_v1 }
 0x57c   : > { %v3139_v5 = vpack.c.bf16 %v2099_v60, %v2097_v57  ;;  %v3666_v0 = vpop.permute.xlu1 %3665 }
 0x57d   : > { %v2096_v6 = vsel %vm924_vm11, %v3642_v4, %v3637_v54  ;;  %v2098_v7 = vsel %vm924_vm11, %v3643_v35, %v3662_v30  ;;  %3138 = vmatpush1.bf16.msk.msra.mxu1 %vm4342_vm4, %v3136_v13  ;;  %v3668_v24 = vunpack.i.h.bf16 %v3666_v0  ;;  %v3667_v37 = vunpack.i.l.bf16 %v3666_v0 }
 0x57e   : > { %v3142_v8 = vpack.c.bf16 %v2098_v7, %v2096_v6  ;;  %v3656_v15 = vpop.permute.xlu0 %3655  ;;  %3141 = vmatprep.subr.msk.bf16.mxu1 %vm4333_vm3, %v3139_v5 }
 0x57f   : > { %v3658_v16 = vunpack.i.h.bf16 %v3656_v15  ;;  %v3657_v45 = vunpack.i.l.bf16 %v3656_v15  ;;  %v2188_v3 = vsel %vm1021_vm12, %v3667_v37, %v3652_v23 }
 0x580   : > { %v4840_v20 = vpop.permute.xlu1 %3675 }
 0x581   : > { %3144 = vmatpush1.bf16.msk.msra.mxu1 %vm4342_vm4, %v3142_v8  ;;  %v2191_v36 = vsel %vm1021_vm12, %v3657_v45, %v3658_v16  ;;  %v3678_v14 = vunpack.i.h.bf16 %v4840_v20  ;;  %v3677_v22 = vunpack.i.l.bf16 %v4840_v20 }
 0x582   : > { %v3671_v21 = vpop.permute.xlu0 %3670  ;;  %3146 = vmatprep.subr.bf16.mxu1 %v3145_v44  ;;  %v2190_v44 = vsel %vm1021_vm12, %v3668_v24, %v3657_v45  ;;  %v3153_v38 = vpack.c.bf16 %v2191_v36, %v2189_v39 }
 0x583   : > { %v3673_v63 = vunpack.i.h.bf16 %v3671_v21  ;;  %v3672_v10 = vunpack.i.l.bf16 %v3671_v21  ;;  %v2269_v62 = vsel %vm1102_vm13, %v3677_v22, %v3678_v14 }
 0x584   : > { %v3686_v31 = vpop.permute.xlu1 %3685 }
 0x585   : > { %3148 = vmatpush1.bf16.msra.mxu1 %v3147_v26  ;;  %v3156_v26 = vpack.c.bf16 %v2190_v44, %v2188_v3  ;;  %v2193_v33 = vsel %vm1021_vm12, %v3672_v10, %v3673_v63  ;;  %v3688_v46 = vunpack.i.h.bf16 %v3686_v31  ;;  %v3687_v40 = vunpack.i.l.bf16 %v3686_v31 }
 0x586   : > { %v3681_v34 = vpop.permute.xlu0 %3680  ;;  %3150 = vmatprep.subr.bf16.mxu1 %v3149_v27 }
 0x587   : > { %v3683_v27 = vunpack.i.h.bf16 %v3681_v34  ;;  %v3682_v42 = vunpack.i.l.bf16 %v3681_v34  ;;  %v2268_v0 = vsel %vm1102_vm13, %v3687_v40, %v3677_v22 }
 0x588   : > { %v3696_v48 = vpop.permute.xlu1 %3695 }
 0x589   : > { %v3698_v47 = vunpack.i.h.bf16 %v3696_v48  ;;  %v3697_v52 = vunpack.i.l.bf16 %v3696_v48  ;;  %3152 = vmatpush1.bf16.msra.mxu1 %v3151_v53  ;;  %v2271_v12 = vsel %vm1102_vm13, %v3682_v42, %v3683_v27  ;;  %v2270_v57 = vsel %vm1102_vm13, %v3688_v46, %v3682_v42 }
 0x58a   : > { %v3691_v9 = vpop.permute.xlu0 %3690  ;;  %3155 = vmatprep.subr.msk.bf16.mxu1 %vm4422_vm9, %v3153_v38  ;;  %v3165_v25 = vpack.c.bf16 %v2271_v12, %v2269_v62  ;;  %v3168_v7 = vpack.c.bf16 %v2270_v57, %v2268_v0  ;;  %v2456_v62 = vld [vmem:[#allocation4 + $0x20] sm:$0xff] }
 0x58b   : > { %v2195_v32 = vsel %vm1021_vm12, %v3697_v52, %v3698_v47  ;;  %v3693_v11 = vunpack.i.h.bf16 %v3691_v9  ;;  %v3692_v29 = vunpack.i.l.bf16 %v3691_v9 }
 0x58c   : > { %v3159_v50 = vpack.c.bf16 %v2195_v32, %v2193_v33  ;;  %v3701_v18 = vpop.permute.xlu1 %3700 }
 0x58d   : > { %3158 = vmatpush1.bf16.msk.msra.mxu1 %vm4426_vm10, %v3156_v26  ;;  %v3703_v35 = vunpack.i.h.bf16 %v3701_v18  ;;  %v3702_v4 = vunpack.i.l.bf16 %v3701_v18  ;;  %v2273_v6 = vsel %vm1102_vm13, %v3692_v29, %v3693_v11 }
 0x58e   : > { %v3706_v53 = vpop.permute.xlu0 %3705  ;;  %3161 = vmatprep.subr.msk.bf16.mxu1 %vm4422_vm9, %v3159_v50 }
 0x58f   : > { %v3708_v51 = vunpack.i.h.bf16 %v3706_v53  ;;  %v3707_v59 = vunpack.i.l.bf16 %v3706_v53  ;;  %v2349_v31 = vsel %vm1183_vm14, %v3702_v4, %v3703_v35 }
 0x590   : > { %v3716_v58 = vpop.permute.xlu1 %3715 }
 0x591   : > { %v2192_v49 = vsel %vm1021_vm12, %v3707_v59, %v3672_v10  ;;  %v2194_v54 = vsel %vm1021_vm12, %v3708_v51, %v3697_v52  ;;  %v3718_v55 = vunpack.i.h.bf16 %v3716_v58  ;;  %v3717_v61 = vunpack.i.l.bf16 %v3716_v58  ;;  %v2452_v58 = vld [vmem:[#allocation4] sm:$0xff] }
 0x592   : > { %v3162_v17 = vpack.c.bf16 %v2194_v54, %v2192_v49  ;;  %v3711_v30 = vpop.permute.xlu0 %3710 }
 0x593   : > { %v2275_v1 = vsel %vm1102_vm13, %v3717_v61, %v3718_v55  ;;  %v3713_v13 = vunpack.i.h.bf16 %v3711_v30  ;;  %v3712_v60 = vunpack.i.l.bf16 %v3711_v30 }
 0x594   : > { %v3721_v5 = vpop.permute.xlu1 %3720  ;;  %3164 = vmatpush1.bf16.msk.msra.mxu1 %vm4426_vm10, %v3162_v17  ;;  %v3171_v8 = vpack.c.bf16 %v2275_v1, %v2273_v6 }
 0x595   : > { %3167 = vmatprep.subr.msk.bf16.mxu1 %vm4333_vm3, %v3165_v25  ;;  %v3723_v15 = vunpack.i.h.bf16 %v3721_v5  ;;  %v3722_v16 = vunpack.i.l.bf16 %v3721_v5  ;;  %v2351_v28 = vsel %vm1183_vm14, %v3712_v60, %v3713_v13  ;;  %v2455_v13 = vld [vmem:[#allocation4 + $0x18] sm:$0xff] }
 0x596   : > { %v3726_v20 = vpop.permute.xlu0 %3725  ;;  %v3177_v10 = vpack.c.bf16 %v2351_v28, %v2349_v31  ;;  %v2457_v28 = vld [vmem:[#allocation4 + $0x28] sm:$0xff] }
 0x597   : > { %v3728_v45 = vunpack.i.h.bf16 %v3726_v20  ;;  %v3727_v21 = vunpack.i.l.bf16 %v3726_v20  ;;  %v2348_v48 = vsel %vm1183_vm14, %v3722_v16, %v3702_v4  ;;  %v2350_v47 = vsel %vm1183_vm14, %v3723_v15, %v3712_v60  ;;  %v2459_v4 = vld [vmem:[#allocation4 + $0x38] sm:$0xff]  ;;  %v2462_v16 = vld [vmem:[#allocation4 + $0x50] sm:$0xff] }
 0x598   : > { %v3736_v23 = vpop.permute.xlu1 %3735  ;;  %3170 = vmatpush1.bf16.msk.msra.mxu1 %vm4342_vm4, %v3168_v7  ;;  %v3179_v26 = vpack.c.bf16 %v2350_v47, %v2348_v48 }
 0x599   : > { %v2272_v36 = vsel %vm1102_vm13, %v3727_v21, %v3692_v29  ;;  %v2274_v24 = vsel %vm1102_vm13, %v3728_v45, %v3717_v61  ;;  %v3738_v37 = vunpack.i.h.bf16 %v3736_v23  ;;  %v3737_v34 = vunpack.i.l.bf16 %v3736_v23  ;;  %3173 = vmatprep.subr.msk.bf16.mxu1 %vm4333_vm3, %v3171_v8  ;;  %v2458_v8 = vld [vmem:[#allocation4 + $0x30] sm:$0xff]  ;;  %v2461_v21 = vld [vmem:[#allocation4 + $0x48] sm:$0xff]  ;;  %v2463_v23 = vld [vmem:[#allocation4 + $0x58] sm:$0xff] }
 0x59a   : > { %v3174_v39 = vpack.c.bf16 %v2274_v24, %v2272_v36  ;;  %v3731_v63 = vpop.permute.xlu0 %3730 }
 0x59b   : > { %v3733_v44 = vunpack.i.h.bf16 %v3731_v63  ;;  %v3732_v38 = vunpack.i.l.bf16 %v3731_v63  ;;  %v2355_v9 = vsel %vm1183_vm14, %v3737_v34, %v3738_v37 }
 0x59c   : > { %v3746_v52 = vpop.permute.xlu1 %3745  ;;  %3176 = vmatpush1.bf16.msk.msra.mxu1 %vm4342_vm4, %v3174_v39  ;;  %v3854_v39 = vld [vmem:[%s4119_s27] sm:$0xff] }
 0x59d   : > { %3178 = vmatprep.subr.bf16.mxu1 %v3177_v10  ;;  %v2353_v3 = vsel %vm1183_vm14, %v3732_v38, %v3733_v44  ;;  %v3748_v42 = vunpack.i.h.bf16 %v3746_v52  ;;  %v3747_v50 = vunpack.i.l.bf16 %v3746_v52  ;;  %v3855_v44 = vld [vmem:[%s4119_s27 + $0x8] sm:$0xff] }
 0x59e   : > { %v3741_v56 = vpop.permute.xlu0 %3740  ;;  %v3181_v33 = vpack.c.bf16 %v2355_v9, %v2353_v3  ;;  %v3856_v3 = vld [vmem:[%s4119_s27 + $0x10] sm:$0xff] }
 0x59f   : > { %v3743_v32 = vunpack.i.h.bf16 %v3741_v56  ;;  %v3742_v27 = vunpack.i.l.bf16 %v3741_v56  ;;  %v2421_v12 = vsel %vm1256_vm15, %v3747_v50, %v3748_v42 }
 0x5a0   : > { %v3756_v18 = vpop.permute.xlu1 %3755  ;;  %3180 = vmatpush1.bf16.msra.mxu1 %v3179_v26  ;;  %v3857_v26 = vld [vmem:[%s4119_s27 + $0x18] sm:$0xff] }
 0x5a1   : > { %v3757_v14 = vunpack.i.l.bf16 %v3756_v18  ;;  %3182 = vmatprep.subr.bf16.mxu1 %v3181_v33  ;;  %v2352_v22 = vsel %vm1183_vm14, %v3742_v27, %v3732_v38  ;;  %v2354_v2 = vsel %vm1183_vm14, %v3743_v32, %v3737_v34  ;;  %v3758_v51 = vunpack.i.h.bf16 %v3756_v18  ;;  %v3858_v18 = vld [vmem:[%s4119_s27 + $0x20] sm:$0xff] }
 0x5a2   : > { %v3751_v53 = vpop.permute.xlu0 %3750  ;;  %v3183_v46 = vpack.c.bf16 %v2354_v2, %v2352_v22  ;;  %v3859_v2 = vld [vmem:[%s4119_s27 + $0x28] sm:$0xff] }
 0x5a3   : > { %v3753_v59 = vunpack.i.h.bf16 %v3751_v53  ;;  %v3752_v40 = vunpack.i.l.bf16 %v3751_v53  ;;  %v2420_v11 = vsel %vm1256_vm15, %v3757_v14, %v3747_v50 }
 0x5a4   : > { %v3766_v29 = vpop.permute.xlu1 %3765  ;;  %3184 = vmatpush1.bf16.msra.mxu1 %v3183_v46 }
 0x5a5   : > { %v2422_v49 = vsel %vm1256_vm15, %v3758_v51, %v3752_v40  ;;  %v2423_v54 = vsel %vm1256_vm15, %v3752_v40, %v3753_v59  ;;  %v3768_v55 = vunpack.i.h.bf16 %v3766_v29  ;;  %v3767_v61 = vunpack.i.l.bf16 %v3766_v29  ;;  %v3861_v29 = vld [vmem:[%s4119_s27 + $0x38] sm:$0xff] }
 0x5a6   : > { %v3185_v57 = vpack.c.bf16 %v2423_v54, %v2421_v12  ;;  %v3188_v17 = vpack.c.bf16 %v2422_v49, %v2420_v11  ;;  %v3761_v30 = vpop.permute.xlu0 %3760  ;;  %v3860_v12 = vld [vmem:[%s4119_s27 + $0x30] sm:$0xff]  ;;  %s3896_s27 = scalar_lea.vmem %s3895_s26, 2048 }
 0x5a7   : > { %v3763_v25 = vunpack.i.h.bf16 %v3761_v30  ;;  %v3762_v1 = vunpack.i.l.bf16 %v3761_v30  ;;  %2637 = vmatmul.mubr.f32.vlgmr.msra.gmra.mrb[0].mxu1 %v2452_v58  ;;  %v2427_v60 = vsel %vm1256_vm15, %v3767_v61, %v3768_v55  ;;  %p3898_p3 = scmp.lt.s32.totalorder %s3896_s27, %s3890_s12 }
 0x5a8   : > { %3187 = vmatprep.subr.msk.bf16.mxu1 %vm4422_vm9, %v3185_v57  ;;  %2642 = vmatprep.mubr.f32.mxu1 %v2456_v62 }
 0x5a9   : > { %v2425_v35 = vsel %vm1256_vm15, %v3762_v1, %v3763_v25  ;;  %3190 = vmatpush1.bf16.msk.msra.mxu1 %vm4426_vm10, %v3188_v17  ;;  %p3899_p4 = por %p3898_p3, %p3897_p2 }
 0x5aa   : > { %v3191_v5 = vpack.c.bf16 %v2427_v60, %v2425_v35  ;;  %v3771_v0 = vpop.permute.xlu0 %3770 }
 0x5ab   : > { %v3773_v6 = vunpack.i.h.bf16 %v3771_v0  ;;  %v3772_v7 = vunpack.i.l.bf16 %v3771_v0  ;;  %2643 = vmatmul.mubr.f32.gmra.mrb[2].mxu1 %v2455_v13  ;;  %p3900_p7 = pnand %p3899_p4, %p3893_p12 }
 0x5ac   : > { %3193 = vmatprep.subr.msk.bf16.mxu1 %vm4422_vm9, %v3191_v5  ;;  %2648 = vmatprep.mubr.f32.mxu1 %v2459_v4 }
 0x5ad   : > { %v2424_v15 = vsel %vm1256_vm15, %v3772_v7, %v3762_v1  ;;  %v2426_v20 = vsel %vm1256_vm15, %v3773_v6, %v3767_v61 }
 0x5ae   : > { %v3194_v45 = vpack.c.bf16 %v2426_v20, %v2424_v15 }
 0x5af   : > { %2649 = vmatmul.mubr.f32.gmra.mrb[4].mxu1 %v2458_v8 }
 0x5b0   : > { %3196 = vmatpush1.bf16.msk.msra.mxu1 %vm4426_vm10, %v3194_v45  ;;  %2654 = vmatprep.mubr.f32.mxu1 %v2462_v16 }
 0x5b3   : > { %2655 = vmatmul.mubr.f32.gmra.mrb[6].mxu1 %v2461_v21 }
 0x5b4   : > { %2725 = vmatprep.mubr.f32.mxu1 %v3962_v41 }
 0x5b5   : > { %v2543_v31 = vpop.permute.xlu1 %2542 }
 0x5b7   : > { %2897 = vmatmul.mubr.msk.f32.vlgmr.msra.gmra.mrb[0].mxu1 %vm1397_vm1, %v2454_v19 }
 0x5b8   : > { %2731 = vmatprep.mubr.f32.mxu1 %v3962_v41 }
 0x5b9   : > { %v2553_v56 = vpop.permute.xlu1 %2552 }
 0x5bb   : > { %2898 = vmatmul.mubr.msk.f32.gmra.mrb[2].mxu1 %vm1397_vm1, %v2457_v28  ;;  %v2548_v10 = vpop.permute.xlu0 %2547 }
 0x5bc   : > { %2737 = vmatprep.mubr.f32.mxu1 %v3962_v41 }
 0x5bf   : > { %2899 = vmatmul.mubr.msk.f32.gmra.mrb[4].mxu1 %vm1397_vm1, %v2460_v43  ;;  %v2558_v22 = vpop.permute.xlu0 %2557 }
 0x5c0   : > { %2743 = vmatprep.mubr.f32.mxu1 %v3962_v41 }
 0x5c3   : > { %2900 = vmatmul.mubr.msk.f32.gmra.mrb[6].mxu1 %vm1397_vm1, %v2463_v23 }
 0x68a   : > { %v2727_v36 = vpop.f32.mrb[0].mxu1 }
 0x68b   : > { %v3205_v24 = vadd.f32 %v2727_v36, %v2543_v31  ;;  %v2729_v37 = vpop.f32.mrb[1].mxu1 }
 0x68c   : > { %v3206_v34 = vadd.f32 %v2729_v37, %v2543_v31 }
 0x68d   : > { %v2750_v63 = vadd.f32 %v3854_v39, %v3205_v24 }
 0x68e   : > { %v2751_v38 = vadd.f32 %v3855_v44, %v3206_v34  ;;  %v2733_v48 = vpop.f32.mrb[2].mxu1 }
 0x68f   : > { %2758 = vst [vmem:[%s4927_s25] sm:$0xff] %v2750_v63  ;;  %v3207_v41 = vadd.f32 %v2733_v48, %v2548_v10  ;;  %v2735_v47 = vpop.f32.mrb[3].mxu1 }
 0x690   : > { %2759 = vst [vmem:[%s4927_s25 + $0x8] sm:$0xff] %v2751_v38  ;;  %v3208_v52 = vadd.f32 %v2735_v47, %v2548_v10 }
 0x691   : > { %v2752_v9 = vadd.f32 %v3856_v3, %v3207_v41 }
 0x692   : > { %v2753_v33 = vadd.f32 %v3857_v26, %v3208_v52  ;;  %v2739_v32 = vpop.f32.mrb[4].mxu1 }
 0x693   : > { %2760 = vst [vmem:[%s4927_s25 + $0x10] sm:$0xff] %v2752_v9  ;;  %v3209_v27 = vadd.f32 %v2739_v32, %v2553_v56  ;;  %v2741_v42 = vpop.f32.mrb[5].mxu1 }
 0x694   : > { %2761 = vst [vmem:[%s4927_s25 + $0x18] sm:$0xff] %v2753_v33  ;;  %v3210_v50 = vadd.f32 %v2741_v42, %v2553_v56 }
 0x695   : > { %v2754_v14 = vadd.f32 %v3858_v18, %v3209_v27 }
 0x696   : > { %v2755_v53 = vadd.f32 %v3859_v2, %v3210_v50  ;;  %v2745_v46 = vpop.f32.mrb[6].mxu1 }
 0x697   : > { %2762 = vst [vmem:[%s4927_s25 + $0x20] sm:$0xff] %v2754_v14  ;;  %v3211_v51 = vadd.f32 %v2745_v46, %v2558_v22  ;;  %v2747_v59 = vpop.f32.mrb[7].mxu1 }
 0x698   : > { %2763 = vst [vmem:[%s4927_s25 + $0x28] sm:$0xff] %v2755_v53  ;;  %v3212_v40 = vadd.f32 %v2747_v59, %v2558_v22 }
 0x699   : > { %v2756_v11 = vadd.f32 %v3860_v12, %v3211_v51 }
 0x69a   : > { %v2757_v58 = vadd.f32 %v3861_v29, %v3212_v40 }
 0x69b   : > { %2764 = vst [vmem:[%s4927_s25 + $0x30] sm:$0xff] %v2756_v11 }
 0x69c   : > { %2765 = vst [vmem:[%s4927_s25 + $0x38] sm:$0xff] %v2757_v58 }
 0x69d   : > { %3903 = shalt.err (!%p3900_p7)
}
 0x69e   : > { %s3904_s28 = scalar_lea.hbm %s4948_s18, 1024  ;;  %s3908_s20 = scalar_lea.hbm %s5006_s10, 2048 }
 0x69f   : > { %p3905_p8 = scmp.ne.s32.totalorder %s4948_s18, %s3904_s28  ;;  %p3909_p1 = scmp.lt.u32.totalorder %s4948_s18, %s5006_s10 }
 0x6a0   : > { %p3910_p0 = scmp.lt.u32.totalorder %s3908_s20, %s3904_s28  ;;  %p3912_p6 = scmp.lt.u32.totalorder %s3904_s28, %s4948_s18 }
 0x6a1   : > { %p3906_p11 = pnand %p3905_p8, %p5048_p9 }
 0x6a2   : > { %p3911_p5 = por %p3910_p0, %p3909_p1 }
 0x6a3   : > { %p3907_p13 = pneg %p3906_p11 }
 0x6a4   : > { %p3913_p10 = por %p3912_p6, %p3911_p5 }
 0x6a6   : > { %p3914_p12 = pnand %p3913_p10, %p3907_p13 }
 0x6a8   : > { %3917 = shalt.err (!%p3914_p12)
}
 0x6a9   : > { %s3972_s12 = smov 256  }
 0x6aa   : > { %3233 = dma.vmem_to_hbm [thread:$0]  (%p5048_p9), %s4941_s29, 1024, %s4948_s18, %s4954_s17, %s3972_s12, %s3972_s12, %s5042_s11  }
 0x6ab PF: > { %p3245_p2 = scmp.ge.s32.totalorder %s3956_s16, 2  ;;  %s2795_s26 = sand.u32 1, %s3944_s13  }
 0x6ac   : > { %p5049_p3 = scmp.ne.s32.totalorder %s5026_s24, 0  ;;  %s2796_s27 = scalar_lea.sflag [#allocation6], %s2795_s26 }
 0x6ae   : > { %p3240_p4 = pnand %p3245_p2, %p5049_p3 }
 0x6b0   : > { %3939 = dma.done.wait (!%p3240_p4), %s2796_s27, 1024  }
 0x6b1   : > { %3941 = vsyncadd (!%p3240_p4), %s2796_s27, 4294966272  ;;  %p21_p7 = scmp.ge.s32.totalorder %s4053_s19, 4   ;;  %s5050_s13 = smov %s3948_s14 }
 0x6b2   : > { %s5051_s14 = smov %s3952_s15  ;;  %s5052_s15 = smov %s4064_s22 }
 0x6b3   : > { %s5053_s16 = smov %s4053_s19  ;;  %23 = sbr.rel (!%p21_p7) target bundleno = 6 (0x6), region = 103 }
 0x6ba   :  { %2801 = vsyncpa [#allocation5], 1 }
 0x6bb   :  { %2803 = vsyncpa [#allocation5 + $0x1], 1 }
 0x6bc   :  { %2804 = vsyncpa [#allocation6], 1 }
 0x6bd   :  { %2806 = vsyncpa [#allocation6 + $0x1], 1 }

</bundles_post_ra>
